<compile_context>
chip_gen: v5e
topology: v5e:2x2
jax: 0.10.0
libtpu: 0.0.40
codegen_flags: <defaults>
</compile_context>

<pallas_src>
import functools

import jax
import jax.numpy as jnp
from jax.experimental import pallas as pl
from jax.experimental.pallas import tpu as pltpu


# "configuration" constants - small but lane/sublane friendly
DICTIONARY_LENGTH = 128     # configuration.dictionary_length   (V)
EMBEDDING_SIZE = 128        # configuration.embedding_size      (E)
KQV_SIZE = 128              # configuration.kqv_size            (K == H2)
SPELLER_HIDDEN_SIZE = 128   # configuration.speller_hidden_size (H1)
BATCH_SIZE = 8              # configuration.batch_size          (B)


def _lstm_gates(gates, c_prev, hidden):
    """PyTorch nn.LSTMCell gate order: i, f, g, o (128-lane aligned slices)."""
    i = jax.nn.sigmoid(gates[:, 0 * hidden:1 * hidden])
    f = jax.nn.sigmoid(gates[:, 1 * hidden:2 * hidden])
    g = jnp.tanh(gates[:, 2 * hidden:3 * hidden])
    o = jax.nn.sigmoid(gates[:, 3 * hidden:4 * hidden])
    c_new = f * c_prev + i * g
    h_new = o * jnp.tanh(c_new)
    return h_new, c_new


def _decoder_fused_kernel(ids_ref, ctx_ref, h1_0_ref, c1_0_ref, h2_0_ref,
                          c2_0_ref, w1_ref, b1_ref, w2_ref, b2_ref,
                          h2_all_ref, c2_all_ref, h1_f_ref, c1_f_ref,
                          h2_f_ref, c2_f_ref,
                          h1_s, c1_s, h2_s, c2_s,
                          *, hidden1, hidden2, vocab):
    """One fused decode step t of the time grid.

    Weights (w1/w2/b1/b2) are VMEM-resident (constant index_map); the
    recurrent state lives in VMEM scratch and persists across grid steps.
    """
    t = pl.program_id(0)
    f32 = jnp.float32
    bf16 = jnp.bfloat16

    # Initialize the recurrent state from the provided initial state at t == 0.
    @pl.when(t == 0)
    def _():
        h1_s[...] = h1_0_ref[...]
        c1_s[...] = c1_0_ref[...]
        h2_s[...] = h2_0_ref[...]
        c2_s[...] = c2_0_ref[...]

    # One-hot of this step's char ids (embedding table is pre-folded into w1).
    ids = ids_ref[...]                                            # (B, 1) int32
    bsz = ids.shape[0]
    iota_v = jax.lax.broadcasted_iota(jnp.int32, (bsz, vocab), 1)
    onehot = jnp.where(iota_v == ids, 1.0, 0.0).astype(bf16)      # (B, V)

    # Cell 1: gates = [onehot | ctx | h1] @ [[table@Wx_emb];[Wx_ctx];[Wh1]] + b1
    x1 = jnp.concatenate(
        [onehot, ctx_ref[...].astype(bf16), h1_s[...].astype(bf16)], axis=1)
    gates1 = jnp.dot(x1, w1_ref[...], preferred_element_type=f32) + b1_ref[...]
    h1n, c1n = _lstm_gates(gates1, c1_s[...], hidden1)

    # Cell 2: gates = [h1 | h2] @ [[Wx2];[Wh2]] + b2
    x2 = jnp.concatenate([h1n.astype(bf16), h2_s[...].astype(bf16)], axis=1)
    gates2 = jnp.dot(x2, w2_ref[...], preferred_element_type=f32) + b2_ref[...]
    h2n, c2n = _lstm_gates(gates2, c2_s[...], hidden2)

    # Carry the state in VMEM scratch for the next step.
    h1_s[...] = h1n
    c1_s[...] = c1n
    h2_s[...] = h2n
    c2_s[...] = c2n

    # Per-step outputs + final state (constant-index blocks, written back once).
    h2_all_ref[...] = h2n
    c2_all_ref[...] = c2n
    h1_f_ref[...] = h1n
    c1_f_ref[...] = c1n
    h2_f_ref[...] = h2n
    c2_f_ref[...] = c2n


def prepare_decoder_params(raw):
    """Fold / stack / cast raw f32 decoder parameters into the kernel layout.

    raw keys: 'embedding' (V,E), 'wx1_emb' (E,4H1), 'wx1_ctx' (K,4H1),
              'wh1' (H1,4H1), 'b1' (1,4H1), 'wx2' (H1,4H2), 'wh2' (H2,4H2),
              'b2' (1,4H2).
    """
    table = raw['embedding'].astype(jnp.float32)               # (V, E)
    folded = table @ raw['wx1_emb'].astype(jnp.float32)        # (V, 4*H1)
    w1 = jnp.concatenate(
        [folded, raw['wx1_ctx'].astype(jnp.float32),
         raw['wh1'].astype(jnp.float32)], axis=0)              # (V+K+H1, 4*H1)
    w2 = jnp.concatenate(
        [raw['wx2'].astype(jnp.float32),
         raw['wh2'].astype(jnp.float32)], axis=0)              # (H1+H2, 4*H2)
    V = table.shape[0]
    K = raw['wx1_ctx'].shape[0]
    H1 = raw['wh1'].shape[0]
    H2 = raw['wh2'].shape[0]
    return {
        'w1': w1.astype(jnp.bfloat16),                         # bf16 weights
        'b1': raw['b1'].astype(jnp.float32).reshape(1, 4 * H1),
        'w2': w2.astype(jnp.bfloat16),
        'b2': raw['b2'].astype(jnp.float32).reshape(1, 4 * H2),
        'dims': (V, K, H1, H2),
    }


def decoder_decode(char_ids, context, prep, init_state=None):
    """Run T fused Decoder.forward steps (char_index = 0..T-1 semantics).

    Args:
      char_ids:   (T, B) int32 token indices.
      context:    (T, B, 1, K) or (T, B, K) float32 attention contexts.
      prep:       output of prepare_decoder_params.
      init_state: optional (h1, c1, h2, c2); zeros if None (char_index==0 reset).

    Returns:
      (h2_all (T,B,H2), c2_all (T,B,H2), final_state (h1,c1,h2,c2))
    """
    V, K, H1, H2 = prep['dims']
    T, B = char_ids.shape
    if context.ndim == 4:                       # context.squeeze(1)
        context = context[:, :, 0, :]
    context = context.astype(jnp.float32)
    ids3d = char_ids.reshape(T, B, 1).astype(jnp.int32)

    if init_state is None:                      # char_index == 0 reset semantics
        init_state = (jnp.zeros((B, H1), jnp.float32),
                      jnp.zeros((B, H1), jnp.float32),
                      jnp.zeros((B, H2), jnp.float32),
                      jnp.zeros((B, H2), jnp.float32))
    h1_0, c1_0, h2_0, c2_0 = init_state

    per_step = lambda cols: pl.BlockSpec((None, B, cols), lambda t: (t, 0, 0))
    resident = lambda r, c: pl.BlockSpec((r, c), lambda t: (0, 0))

    in_specs = [
        per_step(1),                       # ids (streamed per step)
        per_step(K),                       # context (streamed per step)
        resident(B, H1),                   # h1_0
        resident(B, H1),                   # c1_0
        resident(B, H2),                   # h2_0
        resident(B, H2),                   # c2_0
        resident(V + K + H1, 4 * H1),      # w1  (DMA'd once, VMEM-resident)
        resident(1, 4 * H1),               # b1
        resident(H1 + H2, 4 * H2),         # w2  (DMA'd once, VMEM-resident)
        resident(1, 4 * H2),               # b2
    ]
    out_specs = (
        per_step(H2),                      # h2 per step
        per_step(H2),                      # c2 per step
        resident(B, H1),                   # final h1
        resident(B, H1),                   # final c1
        resident(B, H2),                   # final h2
        resident(B, H2),                   # final c2
    )
    out_shape = (
        jax.ShapeDtypeStruct((T, B, H2), jnp.float32),
        jax.ShapeDtypeStruct((T, B, H2), jnp.float32),
        jax.ShapeDtypeStruct((B, H1), jnp.float32),
        jax.ShapeDtypeStruct((B, H1), jnp.float32),
        jax.ShapeDtypeStruct((B, H2), jnp.float32),
        jax.ShapeDtypeStruct((B, H2), jnp.float32),
    )
    scratch_shapes = [
        pltpu.VMEM((B, H1), jnp.float32), pltpu.VMEM((B, H1), jnp.float32),
        pltpu.VMEM((B, H2), jnp.float32), pltpu.VMEM((B, H2), jnp.float32),
    ]

    inputs_all = (ids3d, context, h1_0, c1_0, h2_0, c2_0,
                  prep['w1'], prep['b1'], prep['w2'], prep['b2'])
    flops = 2 * T * B * ((V + K + H1) * 4 * H1 + (H1 + H2) * 4 * H2)
    transcendentals = T * B * 5 * (H1 + H2)
    bytes_accessed = sum(int(a.size) * a.dtype.itemsize for a in inputs_all)
    bytes_accessed += 4 * (2 * T * B * H2 + 2 * B * H1 + 2 * B * H2)

    kernel = functools.partial(_decoder_fused_kernel,
                               hidden1=H1, hidden2=H2, vocab=V)

    h2_all, c2_all, h1_f, c1_f, h2_f, c2_f = pl.pallas_call(
        kernel,
        out_shape=out_shape,
        grid_spec=pltpu.PrefetchScalarGridSpec(
            num_scalar_prefetch=0,
            grid=(T,),
            in_specs=in_specs,
            out_specs=out_specs,
            scratch_shapes=scratch_shapes),
        compiler_params=pltpu.CompilerParams(
            dimension_semantics=("arbitrary",)),      # sequential recurrence
        cost_estimate=pl.CostEstimate(flops=flops,
                                      transcendentals=transcendentals,
                                      bytes_accessed=bytes_accessed),
    )(*inputs_all)

    return h2_all, c2_all, (h1_f, c1_f, h2_f, c2_f)


def decoder_forward(char_ids, context, char_index, prep, state=None):
    """Single Decoder.forward step (T == 1 call of the fused kernel)."""
    # char_index is a trace-time reset flag (Python int), as in the PyTorch code.
    char_index = int(char_index)
    if context.ndim == 3:                     # (B, 1, K) -> squeeze(1)
        context = context[:, 0, :]
    if char_index == 0:
        state = None                          # reset recurrent state
    h2_all, c2_all, final_state = decoder_decode(
        char_ids[None, :], context[None, :, :], prep, init_state=state)
    return (h2_all[0], c2_all[0]), final_state


# ---------------------------------------------------------------------------
# Pure-JAX reference of the same math (bf16 weights, f32 state) for checking.
# ---------------------------------------------------------------------------
def _decoder_reference(char_ids, context, prep, init_state=None):
    V, K, H1, H2 = prep['dims']
    T, B = char_ids.shape
    if context.ndim == 4:
        context = context[:, :, 0, :]
    f32, bf16 = jnp.float32, jnp.bfloat16
    w1 = prep['w1'].astype(f32)
    w2 = prep['w2'].astype(f32)
    b1, b2 = prep['b1'], prep['b2']
    if init_state is None:
        h1 = jnp.zeros((B, H1), f32); c1 = jnp.zeros((B, H1), f32)
        h2 = jnp.zeros((B, H2), f32); c2 = jnp.zeros((B, H2), f32)
    else:
        h1, c1, h2, c2 = init_state
    h2s, c2s = [], []
    for t in range(T):
        onehot = jax.nn.one_hot(char_ids[t], V, dtype=f32)
        x1 = jnp.concatenate([onehot,
                              context[t].astype(bf16).astype(f32),
                              h1.astype(bf16).astype(f32)], axis=1)
        h1, c1 = _lstm_gates(x1 @ w1 + b1, c1, H1)
        x2 = jnp.concatenate([h1.astype(bf16).astype(f32),
                              h2.astype(bf16).astype(f32)], axis=1)
        h2, c2 = _lstm_gates(x2 @ w2 + b2, c2, H2)
        h2s.append(h2); c2s.append(c2)
    return jnp.stack(h2s), jnp.stack(c2s), (h1, c1, h2, c2)


if __name__ == "__main__":
    key = jax.random.PRNGKey(0)
    B, V, E, K = BATCH_SIZE, DICTIONARY_LENGTH, EMBEDDING_SIZE, KQV_SIZE
    H1, H2 = SPELLER_HIDDEN_SIZE, KQV_SIZE
    T = 6                                  # decode steps fused into one launch

    keys = jax.random.split(key, 10)
    char_ids = jax.random.randint(keys[0], (T, B), 0, V, dtype=jnp.int32)
    context = jax.random.normal(keys[1], (T, B, 1, K), dtype=jnp.float32)

    scale = 0.1
    raw = {
        'embedding': jax.random.normal(keys[2], (V, E), jnp.float32) * scale,
        'wx1_emb':   jax.random.normal(keys[3], (E, 4 * H1), jnp.float32) * scale,
        'wx1_ctx':   jax.random.normal(keys[4], (K, 4 * H1), jnp.float32) * scale,
        'wh1':       jax.random.normal(keys[5], (H1, 4 * H1), jnp.float32) * scale,
        'b1':        jax.random.normal(keys[6], (1, 4 * H1), jnp.float32) * scale,
        'wx2':       jax.random.normal(keys[7], (H1, 4 * H2), jnp.float32) * scale,
        'wh2':       jax.random.normal(keys[8], (H2, 4 * H2), jnp.float32) * scale,
        'b2':        jax.random.normal(keys[9], (1, 4 * H2), jnp.float32) * scale,
    }
    prep = prepare_decoder_params(raw)

    # Fused multi-step decode: char_index = 0..T-1 starting from the reset state.
    h2_all, c2_all, final_state = decoder_decode(char_ids, context, prep)
    jax.block_until_ready((h2_all, c2_all))

    # Single-step module.forward semantics, continuing from the fused final state.
    (h2_next, c2_next), _ = decoder_forward(char_ids[0], context[0], T, prep,
                                            state=final_state)
    jax.block_until_ready((h2_next, c2_next))

    # Reference checks.
    r_h2, r_c2, r_state = _decoder_reference(char_ids, context, prep)
    assert h2_all.shape == (T, B, H2) and c2_all.shape == (T, B, H2)
    assert jnp.allclose(h2_all, r_h2, atol=2e-3, rtol=2e-3), "h2 mismatch"
    assert jnp.allclose(c2_all, r_c2, atol=2e-3, rtol=2e-3), "c2 mismatch"
    for got, want in zip(final_state, r_state):
        assert jnp.allclose(got, want, atol=2e-3, rtol=2e-3), "state mismatch"

    r_h2n, r_c2n, _ = _decoder_reference(char_ids[:1], context[:1], prep,
                                         init_state=r_state)
    assert jnp.allclose(h2_next, r_h2n[0], atol=2e-3, rtol=2e-3), "step h2 mismatch"
    assert jnp.allclose(c2_next, r_c2n[0], atol=2e-3, rtol=2e-3), "step c2 mismatch"

    print("KERNEL_OK")
</pallas_src>

<mosaic_0001>
module attributes {stable_mosaic.version = 11 : i64} {
  func.func @_decoder_fused_kernel(%arg0: i32, %arg1: memref<1x8x1xi32, #tpu.memory_space<vmem>>, %arg2: memref<1x8x128xf32, #tpu.memory_space<vmem>>, %arg3: memref<8x128xf32, #tpu.memory_space<vmem>>, %arg4: memref<8x128xf32, #tpu.memory_space<vmem>>, %arg5: memref<8x128xf32, #tpu.memory_space<vmem>>, %arg6: memref<8x128xf32, #tpu.memory_space<vmem>>, %arg7: memref<384x512xbf16, #tpu.memory_space<vmem>>, %arg8: memref<1x512xf32, #tpu.memory_space<vmem>>, %arg9: memref<256x512xbf16, #tpu.memory_space<vmem>>, %arg10: memref<1x512xf32, #tpu.memory_space<vmem>>, %arg11: memref<1x8x128xf32, #tpu.memory_space<vmem>>, %arg12: memref<1x8x128xf32, #tpu.memory_space<vmem>>, %arg13: memref<8x128xf32, #tpu.memory_space<vmem>>, %arg14: memref<8x128xf32, #tpu.memory_space<vmem>>, %arg15: memref<8x128xf32, #tpu.memory_space<vmem>>, %arg16: memref<8x128xf32, #tpu.memory_space<vmem>>, %arg17: memref<8x128xf32, #tpu.memory_space<vmem>>, %arg18: memref<8x128xf32, #tpu.memory_space<vmem>>, %arg19: memref<8x128xf32, #tpu.memory_space<vmem>>, %arg20: memref<8x128xf32, #tpu.memory_space<vmem>>) attributes {dimension_semantics = [#tpu.dimension_semantics<arbitrary>], iteration_bounds = array<i64: 6>, scalar_prefetch = 0 : i64, scratch_operands = 4 : i64, tpu.core_type = #tpu.core_type<tc>, window_params = [{transform_indices = @transform_0, window_bounds = array<i64: 1, 8, 1>}, {transform_indices = @transform_1, window_bounds = array<i64: 1, 8, 128>}, {pipeline_mode = #tpu.pipeline_mode<synchronous>, transform_indices = @transform_2, window_bounds = array<i64: 8, 128>}, {pipeline_mode = #tpu.pipeline_mode<synchronous>, transform_indices = @transform_3, window_bounds = array<i64: 8, 128>}, {pipeline_mode = #tpu.pipeline_mode<synchronous>, transform_indices = @transform_4, window_bounds = array<i64: 8, 128>}, {pipeline_mode = #tpu.pipeline_mode<synchronous>, transform_indices = @transform_5, window_bounds = array<i64: 8, 128>}, {pipeline_mode = #tpu.pipeline_mode<synchronous>, transform_indices = @transform_6, window_bounds = array<i64: 384, 512>}, {pipeline_mode = #tpu.pipeline_mode<synchronous>, transform_indices = @transform_7, window_bounds = array<i64: 1, 512>}, {pipeline_mode = #tpu.pipeline_mode<synchronous>, transform_indices = @transform_8, window_bounds = array<i64: 256, 512>}, {pipeline_mode = #tpu.pipeline_mode<synchronous>, transform_indices = @transform_9, window_bounds = array<i64: 1, 512>}, {transform_indices = @transform_10, window_bounds = array<i64: 1, 8, 128>}, {transform_indices = @transform_11, window_bounds = array<i64: 1, 8, 128>}, {pipeline_mode = #tpu.pipeline_mode<synchronous>, transform_indices = @transform_12, window_bounds = array<i64: 8, 128>}, {pipeline_mode = #tpu.pipeline_mode<synchronous>, transform_indices = @transform_13, window_bounds = array<i64: 8, 128>}, {pipeline_mode = #tpu.pipeline_mode<synchronous>, transform_indices = @transform_14, window_bounds = array<i64: 8, 128>}, {pipeline_mode = #tpu.pipeline_mode<synchronous>, transform_indices = @transform_15, window_bounds = array<i64: 8, 128>}]} {
    %c0_i32 = arith.constant 0 : i32
    %0 = arith.cmpi eq, %arg0, %c0_i32 : i32
    %1 = arith.extui %0 : i1 to i32
    %c0_i32_0 = arith.constant 0 : i32
    %2 = arith.cmpi ne, %1, %c0_i32_0 : i32
    scf.if %2 {
      %c0_53 = arith.constant 0 : index
      %c0_54 = arith.constant 0 : index
      %98 = vector.load %arg3[%c0_53, %c0_54] : memref<8x128xf32, #tpu.memory_space<vmem>>, vector<8x128xf32>
      %c0_55 = arith.constant 0 : index
      %c0_56 = arith.constant 0 : index
      %99 = vector.load %arg17[%c0_55, %c0_56] : memref<8x128xf32, #tpu.memory_space<vmem>>, vector<8x128xf32>
      tpu.vector_store %arg17[%c0_55, %c0_56], %98 {strides = array<i32>} : memref<8x128xf32, #tpu.memory_space<vmem>>, vector<8x128xf32>,
      %c0_57 = arith.constant 0 : index
      %c0_58 = arith.constant 0 : index
      %100 = vector.load %arg4[%c0_57, %c0_58] : memref<8x128xf32, #tpu.memory_space<vmem>>, vector<8x128xf32>
      %c0_59 = arith.constant 0 : index
      %c0_60 = arith.constant 0 : index
      %101 = vector.load %arg18[%c0_59, %c0_60] : memref<8x128xf32, #tpu.memory_space<vmem>>, vector<8x128xf32>
      tpu.vector_store %arg18[%c0_59, %c0_60], %100 {strides = array<i32>} : memref<8x128xf32, #tpu.memory_space<vmem>>, vector<8x128xf32>,
      %c0_61 = arith.constant 0 : index
      %c0_62 = arith.constant 0 : index
      %102 = vector.load %arg5[%c0_61, %c0_62] : memref<8x128xf32, #tpu.memory_space<vmem>>, vector<8x128xf32>
      %c0_63 = arith.constant 0 : index
      %c0_64 = arith.constant 0 : index
      %103 = vector.load %arg19[%c0_63, %c0_64] : memref<8x128xf32, #tpu.memory_space<vmem>>, vector<8x128xf32>
      tpu.vector_store %arg19[%c0_63, %c0_64], %102 {strides = array<i32>} : memref<8x128xf32, #tpu.memory_space<vmem>>, vector<8x128xf32>,
      %c0_65 = arith.constant 0 : index
      %c0_66 = arith.constant 0 : index
      %104 = vector.load %arg6[%c0_65, %c0_66] : memref<8x128xf32, #tpu.memory_space<vmem>>, vector<8x128xf32>
      %c0_67 = arith.constant 0 : index
      %c0_68 = arith.constant 0 : index
      %105 = vector.load %arg20[%c0_67, %c0_68] : memref<8x128xf32, #tpu.memory_space<vmem>>, vector<8x128xf32>
      tpu.vector_store %arg20[%c0_67, %c0_68], %104 {strides = array<i32>} : memref<8x128xf32, #tpu.memory_space<vmem>>, vector<8x128xf32>,
    } else {
    }
    %c0 = arith.constant 0 : index
    %c0_1 = arith.constant 0 : index
    %c0_2 = arith.constant 0 : index
    %3 = vector.load %arg1[%c0, %c0_1, %c0_2] : memref<1x8x1xi32, #tpu.memory_space<vmem>>, vector<1x8x1xi32>
    %4 = vector.shape_cast %3 : vector<1x8x1xi32> to vector<8x1xi32>
    %5 = tpu.iota {dimensions = array<i32: 1>} : vector<8x128xi32>
    %6 = vector.broadcast %4 : vector<8x1xi32> to vector<8x128xi32>
    %7 = arith.cmpi eq, %5, %6 : vector<8x128xi32>
    %cst = arith.constant 1.000000e+00 : f32
    %cst_3 = arith.constant 0.000000e+00 : f32
    %8 = vector.broadcast %cst : f32 to vector<8x128xf32>
    %9 = vector.broadcast %cst_3 : f32 to vector<8x128xf32>
    %10 = arith.select %7, %8, %9 : vector<8x128xi1>, vector<8x128xf32>
    %11 = arith.truncf %10 : vector<8x128xf32> to vector<8x128xbf16>
    %c0_4 = arith.constant 0 : index
    %c0_5 = arith.constant 0 : index
    %c0_6 = arith.constant 0 : index
    %12 = vector.load %arg2[%c0_4, %c0_5, %c0_6] : memref<1x8x128xf32, #tpu.memory_space<vmem>>, vector<1x8x128xf32>
    %13 = vector.shape_cast %12 : vector<1x8x128xf32> to vector<8x128xf32>
    %14 = arith.truncf %13 : vector<8x128xf32> to vector<8x128xbf16>
    %c0_7 = arith.constant 0 : index
    %c0_8 = arith.constant 0 : index
    %15 = vector.load %arg17[%c0_7, %c0_8] : memref<8x128xf32, #tpu.memory_space<vmem>>, vector<8x128xf32>
    %16 = arith.truncf %15 : vector<8x128xf32> to vector<8x128xbf16>
    %17 = tpu.concatenate %11, %14, %16 in 1 : vector<8x128xbf16>, vector<8x128xbf16>, vector<8x128xbf16> -> vector<8x384xbf16>
    %c0_9 = arith.constant 0 : index
    %c0_10 = arith.constant 0 : index
    %18 = vector.load %arg7[%c0_9, %c0_10] : memref<384x512xbf16, #tpu.memory_space<vmem>>, vector<384x512xbf16>
    %cst_11 = arith.constant dense<0.000000e+00> : vector<8x512xf32>
    %19 = tpu.matmul %17, %18, %cst_11 {dimension_numbers = #tpu.dot_dimension_numbers<[1], [0], [0], [1], [0, 0, 1, 1], [], []>} : vector<8x384xbf16>, vector<384x512xbf16>, vector<8x512xf32> -> vector<8x512xf32>
    %c0_12 = arith.constant 0 : index
    %c0_13 = arith.constant 0 : index
    %20 = vector.load %arg8[%c0_12, %c0_13] : memref<1x512xf32, #tpu.memory_space<vmem>>, vector<1x512xf32>
    %21 = vector.broadcast %20 : vector<1x512xf32> to vector<8x512xf32>
    %22 = arith.addf %19, %21 : vector<8x512xf32>
    %c0_14 = arith.constant 0 : index
    %c0_15 = arith.constant 0 : index
    %23 = vector.load %arg18[%c0_14, %c0_15] : memref<8x128xf32, #tpu.memory_space<vmem>>, vector<8x128xf32>
    %24 = vector.extract_strided_slice %22 {offsets = [0, 0], sizes = [8, 128], strides = [1, 1]} : vector<8x512xf32> to vector<8x128xf32>
    %25 = arith.negf %24 : vector<8x128xf32>
    %26 = math.exp %25 : vector<8x128xf32>
    %cst_16 = arith.constant 1.000000e+00 : f32
    %27 = vector.broadcast %cst_16 : f32 to vector<8x128xf32>
    %28 = arith.addf %27, %26 : vector<8x128xf32>
    %29 = arith.divf %27, %28 : vector<8x128xf32>
    %30 = vector.extract_strided_slice %22 {offsets = [0, 128], sizes = [8, 128], strides = [1, 1]} : vector<8x512xf32> to vector<8x128xf32>
    %31 = arith.negf %30 : vector<8x128xf32>
    %32 = math.exp %31 : vector<8x128xf32>
    %cst_17 = arith.constant 1.000000e+00 : f32
    %33 = vector.broadcast %cst_17 : f32 to vector<8x128xf32>
    %34 = arith.addf %33, %32 : vector<8x128xf32>
    %35 = arith.divf %33, %34 : vector<8x128xf32>
    %36 = vector.extract_strided_slice %22 {offsets = [0, 256], sizes = [8, 128], strides = [1, 1]} : vector<8x512xf32> to vector<8x128xf32>
    %37 = math.tanh %36 : vector<8x128xf32>
    %38 = vector.extract_strided_slice %22 {offsets = [0, 384], sizes = [8, 128], strides = [1, 1]} : vector<8x512xf32> to vector<8x128xf32>
    %39 = arith.negf %38 : vector<8x128xf32>
    %40 = math.exp %39 : vector<8x128xf32>
    %cst_18 = arith.constant 1.000000e+00 : f32
    %41 = vector.broadcast %cst_18 : f32 to vector<8x128xf32>
    %42 = arith.addf %41, %40 : vector<8x128xf32>
    %43 = arith.divf %41, %42 : vector<8x128xf32>
    %44 = arith.mulf %35, %23 : vector<8x128xf32>
    %45 = arith.mulf %29, %37 : vector<8x128xf32>
    %46 = arith.addf %44, %45 : vector<8x128xf32>
    %47 = math.tanh %46 : vector<8x128xf32>
    %48 = arith.mulf %43, %47 : vector<8x128xf32>
    %49 = arith.truncf %48 : vector<8x128xf32> to vector<8x128xbf16>
    %c0_19 = arith.constant 0 : index
    %c0_20 = arith.constant 0 : index
    %50 = vector.load %arg19[%c0_19, %c0_20] : memref<8x128xf32, #tpu.memory_space<vmem>>, vector<8x128xf32>
    %51 = arith.truncf %50 : vector<8x128xf32> to vector<8x128xbf16>
    %52 = tpu.concatenate %49, %51 in 1 : vector<8x128xbf16>, vector<8x128xbf16> -> vector<8x256xbf16>
    %c0_21 = arith.constant 0 : index
    %c0_22 = arith.constant 0 : index
    %53 = vector.load %arg9[%c0_21, %c0_22] : memref<256x512xbf16, #tpu.memory_space<vmem>>, vector<256x512xbf16>
    %cst_23 = arith.constant dense<0.000000e+00> : vector<8x512xf32>
    %54 = tpu.matmul %52, %53, %cst_23 {dimension_numbers = #tpu.dot_dimension_numbers<[1], [0], [0], [1], [0, 0, 1, 1], [], []>} : vector<8x256xbf16>, vector<256x512xbf16>, vector<8x512xf32> -> vector<8x512xf32>
    %c0_24 = arith.constant 0 : index
    %c0_25 = arith.constant 0 : index
    %55 = vector.load %arg10[%c0_24, %c0_25] : memref<1x512xf32, #tpu.memory_space<vmem>>, vector<1x512xf32>
    %56 = vector.broadcast %55 : vector<1x512xf32> to vector<8x512xf32>
    %57 = arith.addf %54, %56 : vector<8x512xf32>
    %c0_26 = arith.constant 0 : index
    %c0_27 = arith.constant 0 : index
    %58 = vector.load %arg20[%c0_26, %c0_27] : memref<8x128xf32, #tpu.memory_space<vmem>>, vector<8x128xf32>
    %59 = vector.extract_strided_slice %57 {offsets = [0, 0], sizes = [8, 128], strides = [1, 1]} : vector<8x512xf32> to vector<8x128xf32>
    %60 = arith.negf %59 : vector<8x128xf32>
    %61 = math.exp %60 : vector<8x128xf32>
    %cst_28 = arith.constant 1.000000e+00 : f32
    %62 = vector.broadcast %cst_28 : f32 to vector<8x128xf32>
    %63 = arith.addf %62, %61 : vector<8x128xf32>
    %64 = arith.divf %62, %63 : vector<8x128xf32>
    %65 = vector.extract_strided_slice %57 {offsets = [0, 128], sizes = [8, 128], strides = [1, 1]} : vector<8x512xf32> to vector<8x128xf32>
    %66 = arith.negf %65 : vector<8x128xf32>
    %67 = math.exp %66 : vector<8x128xf32>
    %cst_29 = arith.constant 1.000000e+00 : f32
    %68 = vector.broadcast %cst_29 : f32 to vector<8x128xf32>
    %69 = arith.addf %68, %67 : vector<8x128xf32>
    %70 = arith.divf %68, %69 : vector<8x128xf32>
    %71 = vector.extract_strided_slice %57 {offsets = [0, 256], sizes = [8, 128], strides = [1, 1]} : vector<8x512xf32> to vector<8x128xf32>
    %72 = math.tanh %71 : vector<8x128xf32>
    %73 = vector.extract_strided_slice %57 {offsets = [0, 384], sizes = [8, 128], strides = [1, 1]} : vector<8x512xf32> to vector<8x128xf32>
    %74 = arith.negf %73 : vector<8x128xf32>
    %75 = math.exp %74 : vector<8x128xf32>
    %cst_30 = arith.constant 1.000000e+00 : f32
    %76 = vector.broadcast %cst_30 : f32 to vector<8x128xf32>
    %77 = arith.addf %76, %75 : vector<8x128xf32>
    %78 = arith.divf %76, %77 : vector<8x128xf32>
    %79 = arith.mulf %70, %58 : vector<8x128xf32>
    %80 = arith.mulf %64, %72 : vector<8x128xf32>
    %81 = arith.addf %79, %80 : vector<8x128xf32>
    %82 = math.tanh %81 : vector<8x128xf32>
    %83 = arith.mulf %78, %82 : vector<8x128xf32>
    %c0_31 = arith.constant 0 : index
    %c0_32 = arith.constant 0 : index
    %84 = vector.load %arg17[%c0_31, %c0_32] : memref<8x128xf32, #tpu.memory_space<vmem>>, vector<8x128xf32>
    tpu.vector_store %arg17[%c0_31, %c0_32], %48 {strides = array<i32>} : memref<8x128xf32, #tpu.memory_space<vmem>>, vector<8x128xf32>,
    %c0_33 = arith.constant 0 : index
    %c0_34 = arith.constant 0 : index
    %85 = vector.load %arg18[%c0_33, %c0_34] : memref<8x128xf32, #tpu.memory_space<vmem>>, vector<8x128xf32>
    tpu.vector_store %arg18[%c0_33, %c0_34], %46 {strides = array<i32>} : memref<8x128xf32, #tpu.memory_space<vmem>>, vector<8x128xf32>,
    %c0_35 = arith.constant 0 : index
    %c0_36 = arith.constant 0 : index
    %86 = vector.load %arg19[%c0_35, %c0_36] : memref<8x128xf32, #tpu.memory_space<vmem>>, vector<8x128xf32>
    tpu.vector_store %arg19[%c0_35, %c0_36], %83 {strides = array<i32>} : memref<8x128xf32, #tpu.memory_space<vmem>>, vector<8x128xf32>,
    %c0_37 = arith.constant 0 : index
    %c0_38 = arith.constant 0 : index
    %87 = vector.load %arg20[%c0_37, %c0_38] : memref<8x128xf32, #tpu.memory_space<vmem>>, vector<8x128xf32>
    tpu.vector_store %arg20[%c0_37, %c0_38], %81 {strides = array<i32>} : memref<8x128xf32, #tpu.memory_space<vmem>>, vector<8x128xf32>,
    %c0_39 = arith.constant 0 : index
    %c0_40 = arith.constant 0 : index
    %c0_41 = arith.constant 0 : index
    %88 = vector.load %arg11[%c0_39, %c0_40, %c0_41] : memref<1x8x128xf32, #tpu.memory_space<vmem>>, vector<1x8x128xf32>
    %89 = vector.shape_cast %88 : vector<1x8x128xf32> to vector<8x128xf32>
    %90 = vector.shape_cast %83 : vector<8x128xf32> to vector<1x8x128xf32>
    tpu.vector_store %arg11[%c0_39, %c0_40, %c0_41], %90 {strides = array<i32>} : memref<1x8x128xf32, #tpu.memory_space<vmem>>, vector<1x8x128xf32>,
    %c0_42 = arith.constant 0 : index
    %c0_43 = arith.constant 0 : index
    %c0_44 = arith.constant 0 : index
    %91 = vector.load %arg12[%c0_42, %c0_43, %c0_44] : memref<1x8x128xf32, #tpu.memory_space<vmem>>, vector<1x8x128xf32>
    %92 = vector.shape_cast %91 : vector<1x8x128xf32> to vector<8x128xf32>
    %93 = vector.shape_cast %81 : vector<8x128xf32> to vector<1x8x128xf32>
    tpu.vector_store %arg12[%c0_42, %c0_43, %c0_44], %93 {strides = array<i32>} : memref<1x8x128xf32, #tpu.memory_space<vmem>>, vector<1x8x128xf32>,
    %c0_45 = arith.constant 0 : index
    %c0_46 = arith.constant 0 : index
    %94 = vector.load %arg13[%c0_45, %c0_46] : memref<8x128xf32, #tpu.memory_space<vmem>>, vector<8x128xf32>
    tpu.vector_store %arg13[%c0_45, %c0_46], %48 {strides = array<i32>} : memref<8x128xf32, #tpu.memory_space<vmem>>, vector<8x128xf32>,
    %c0_47 = arith.constant 0 : index
    %c0_48 = arith.constant 0 : index
    %95 = vector.load %arg14[%c0_47, %c0_48] : memref<8x128xf32, #tpu.memory_space<vmem>>, vector<8x128xf32>
    tpu.vector_store %arg14[%c0_47, %c0_48], %46 {strides = array<i32>} : memref<8x128xf32, #tpu.memory_space<vmem>>, vector<8x128xf32>,
    %c0_49 = arith.constant 0 : index
    %c0_50 = arith.constant 0 : index
    %96 = vector.load %arg15[%c0_49, %c0_50] : memref<8x128xf32, #tpu.memory_space<vmem>>, vector<8x128xf32>
    tpu.vector_store %arg15[%c0_49, %c0_50], %83 {strides = array<i32>} : memref<8x128xf32, #tpu.memory_space<vmem>>, vector<8x128xf32>,
    %c0_51 = arith.constant 0 : index
    %c0_52 = arith.constant 0 : index
    %97 = vector.load %arg16[%c0_51, %c0_52] : memref<8x128xf32, #tpu.memory_space<vmem>>, vector<8x128xf32>
    tpu.vector_store %arg16[%c0_51, %c0_52], %81 {strides = array<i32>} : memref<8x128xf32, #tpu.memory_space<vmem>>, vector<8x128xf32>,
    return
  }
  func.func @transform_0(%arg0: i32) -> (i32, i32, i32) {
    %c0_i32 = arith.constant 0 : i32
    %c0_i32_0 = arith.constant 0 : i32
    %c0_i32_1 = arith.constant 0 : i32
    return %arg0, %c0_i32, %c0_i32_0 : i32, i32, i32
  }
  func.func @transform_1(%arg0: i32) -> (i32, i32, i32) {
    %c0_i32 = arith.constant 0 : i32
    %c0_i32_0 = arith.constant 0 : i32
    %c0_i32_1 = arith.constant 0 : i32
    return %arg0, %c0_i32, %c0_i32_0 : i32, i32, i32
  }
  func.func @transform_2(%arg0: i32) -> (i32, i32) {
    %c0_i32 = arith.constant 0 : i32
    %c0_i32_0 = arith.constant 0 : i32
    %c0_i32_1 = arith.constant 0 : i32
    return %c0_i32, %c0_i32_0 : i32, i32
  }
  func.func @transform_3(%arg0: i32) -> (i32, i32) {
    %c0_i32 = arith.constant 0 : i32
    %c0_i32_0 = arith.constant 0 : i32
    %c0_i32_1 = arith.constant 0 : i32
    return %c0_i32, %c0_i32_0 : i32, i32
  }
  func.func @transform_4(%arg0: i32) -> (i32, i32) {
    %c0_i32 = arith.constant 0 : i32
    %c0_i32_0 = arith.constant 0 : i32
    %c0_i32_1 = arith.constant 0 : i32
    return %c0_i32, %c0_i32_0 : i32, i32
  }
  func.func @transform_5(%arg0: i32) -> (i32, i32) {
    %c0_i32 = arith.constant 0 : i32
    %c0_i32_0 = arith.constant 0 : i32
    %c0_i32_1 = arith.constant 0 : i32
    return %c0_i32, %c0_i32_0 : i32, i32
  }
  func.func @transform_6(%arg0: i32) -> (i32, i32) {
    %c0_i32 = arith.constant 0 : i32
    %c0_i32_0 = arith.constant 0 : i32
    %c0_i32_1 = arith.constant 0 : i32
    return %c0_i32, %c0_i32_0 : i32, i32
  }
  func.func @transform_7(%arg0: i32) -> (i32, i32) {
    %c0_i32 = arith.constant 0 : i32
    %c0_i32_0 = arith.constant 0 : i32
    %c0_i32_1 = arith.constant 0 : i32
    return %c0_i32, %c0_i32_0 : i32, i32
  }
  func.func @transform_8(%arg0: i32) -> (i32, i32) {
    %c0_i32 = arith.constant 0 : i32
    %c0_i32_0 = arith.constant 0 : i32
    %c0_i32_1 = arith.constant 0 : i32
    return %c0_i32, %c0_i32_0 : i32, i32
  }
  func.func @transform_9(%arg0: i32) -> (i32, i32) {
    %c0_i32 = arith.constant 0 : i32
    %c0_i32_0 = arith.constant 0 : i32
    %c0_i32_1 = arith.constant 0 : i32
    return %c0_i32, %c0_i32_0 : i32, i32
  }
  func.func @transform_10(%arg0: i32) -> (i32, i32, i32) {
    %c0_i32 = arith.constant 0 : i32
    %c0_i32_0 = arith.constant 0 : i32
    %c0_i32_1 = arith.constant 0 : i32
    return %arg0, %c0_i32, %c0_i32_0 : i32, i32, i32
  }
  func.func @transform_11(%arg0: i32) -> (i32, i32, i32) {
    %c0_i32 = arith.constant 0 : i32
    %c0_i32_0 = arith.constant 0 : i32
    %c0_i32_1 = arith.constant 0 : i32
    return %arg0, %c0_i32, %c0_i32_0 : i32, i32, i32
  }
  func.func @transform_12(%arg0: i32) -> (i32, i32) {
    %c0_i32 = arith.constant 0 : i32
    %c0_i32_0 = arith.constant 0 : i32
    %c0_i32_1 = arith.constant 0 : i32
    return %c0_i32, %c0_i32_0 : i32, i32
  }
  func.func @transform_13(%arg0: i32) -> (i32, i32) {
    %c0_i32 = arith.constant 0 : i32
    %c0_i32_0 = arith.constant 0 : i32
    %c0_i32_1 = arith.constant 0 : i32
    return %c0_i32, %c0_i32_0 : i32, i32
  }
  func.func @transform_14(%arg0: i32) -> (i32, i32) {
    %c0_i32 = arith.constant 0 : i32
    %c0_i32_0 = arith.constant 0 : i32
    %c0_i32_1 = arith.constant 0 : i32
    return %c0_i32, %c0_i32_0 : i32, i32
  }
  func.func @transform_15(%arg0: i32) -> (i32, i32) {
    %c0_i32 = arith.constant 0 : i32
    %c0_i32_0 = arith.constant 0 : i32
    %c0_i32_1 = arith.constant 0 : i32
    return %c0_i32, %c0_i32_0 : i32, i32
  }
}

</mosaic_0001>

<bundles_post_ra>
// kernel: tpu_custom_call.1
= control target key start
LH: loop header
LB: loop body
LE: loop exit
PB: predicated region body
PF: predicated region fallthrough
CT: control target
= control target key end

     0   :  { %s4172_s0 = inlined_call_operand.vmem [shape: s32[6,8,1], index: 0, kind: input, shape index: {}]   ;;  %s4173_s1 = inlined_call_operand.vmem [shape: f32[6,8,128], index: 1, kind: input, shape index: {}]   ;;  %s4174_s2 = inlined_call_operand.hbm [shape: f32[8,128], index: 2, kind: input, shape index: {}]   ;;  %s4175_s3 = inlined_call_operand.vmem [shape: f32[8,128], index: 3, kind: input, shape index: {}]   ;;  %s4176_s4 = inlined_call_operand.hbm [shape: f32[8,128], index: 4, kind: input, shape index: {}]   ;;  %s4177_s5 = inlined_call_operand.hbm [shape: f32[8,128], index: 5, kind: input, shape index: {}]   ;;  %s4178_s6 = inlined_call_operand.hbm [shape: bf16[384,512], index: 6, kind: input, shape index: {}]   ;;  %s4179_s7 = inlined_call_operand.vmem [shape: f32[1,512], index: 7, kind: input, shape index: {}]   ;;  %s4180_s8 = inlined_call_operand.hbm [shape: bf16[256,512], index: 8, kind: input, shape index: {}]   ;;  %s4181_s9 = inlined_call_operand.hbm [shape: f32[1,512], index: 9, kind: input, shape index: {}]   ;;  %s4182_s10 = inlined_call_operand.hbm [shape: f32[6,8,128], index: 10, kind: output, shape index: {0}]   ;;  %s4183_s11 = inlined_call_operand.hbm [shape: f32[6,8,128], index: 11, kind: output, shape index: {1}]   ;;  %s4184_s12 = inlined_call_operand.hbm [shape: f32[8,128], index: 12, kind: output, shape index: {2}]   ;;  %s4185_s13 = inlined_call_operand.hbm [shape: f32[8,128], index: 13, kind: output, shape index: {3}]   ;;  %s4186_s14 = inlined_call_operand.hbm [shape: f32[8,128], index: 14, kind: output, shape index: {4}]   ;;  %s4187_s15 = inlined_call_operand.hbm [shape: f32[8,128], index: 15, kind: output, shape index: {5}]  }
   0x1   :  { %4199 = sst [smem:[#allocation41_spill]] %s4174_s2 }
   0x2   :  { %4200 = sst [smem:[#allocation42_spill]] %s4176_s4 }
   0x3   :  { %4201 = sst [smem:[#allocation43_spill]] %s4178_s6 }
   0x4   :  { %4202 = sst [smem:[#allocation44_spill]] %s4182_s10 }
   0x5   :  { %4203 = sst [smem:[#allocation45_spill]] %s4186_s14 }
   0x6   :  { %21 = vsyncpa [#allocation7], 0 }
   0x7   :  { %22 = vsyncpa [#allocation10], 0 }
   0x8   :  { %23 = vsyncpa [#allocation13], 0 }
   0x9   :  { %24 = vsyncpa [#allocation16], 0 }
   0xa   :  { %25 = vsyncpa [#allocation8], 0 }
   0xb   :  { %27 = vsyncpa [#allocation8 + $0x1], 0 }
   0xc   :  { %28 = vsyncpa [#allocation19], 0 }
   0xd   :  { %30 = vsyncpa [#allocation19 + $0x1], 0 }
   0xe   :  { %31 = vsyncpa [#allocation22], 0 }
   0xf   :  { %32 = vsyncpa [#allocation25], 0  ;;  %s3828_s18 = smov 0   ;;  %s3830_s19 = smov 0  }
  0x10   :  { %s3832_s20 = smov 0   ;;  %s3834_s21 = smov 0  }
  0x11 LB: > { %4204 = sst [smem:[#allocation35_spill]] %s3720_s18  ;;  %s3849_s22 = sadd.s32 4294967295, %s3732_s21   ;;  %s3732_s21 = sphi %s3834_s21, %s4235_s21   ;;  %s3728_s20 = sphi %s3832_s20, %s4237_s20   ;;  %s3724_s19 = sphi %s3830_s19, %s4239_s19   ;;  %s3720_s18 = sphi %s3828_s18, %s4238_s18  }
  0x12   : > { %4205 = sst [smem:[#allocation36_spill]] %s3728_s20  ;;  %s4188_s23 = sadd.s32 4294967294, %s3732_s21  }
  0x13   : > { %4206 = sst [smem:[#allocation37_spill]] %s3732_s21  ;;  %s3853_s24 = sadd.s32 1, %s3732_s21  }
  0x14   : > { %4207 = sst [smem:[#allocation38_spill]] %s3853_s24  ;;  %s265_s25 = sadd.s32 1, %s3728_s20 }
  0x15   : > { %s262_s26 = ssub.s32 %s3732_s21, %s3853_s24  ;;  %p275_p0 = scmp.ne.s32.totalorder %s3728_s20, %s3724_s19 }
  0x16   : > { %p263_p1 = scmp.eq.s32.totalorder %s262_s26, 0  ;;  %p276_p2 = scmp.eq.s32.totalorder %s3849_s22, 5 }
  0x17   : > { %p281_p3 = scmp.ne.s32.totalorder %s3724_s19, %s3720_s18  ;;  %p282_p4 = scmp.eq.s32.totalorder %s4188_s23, 5 }
  0x18   : > { %s3866_s27 = scalar_select %p263_p1, %s3728_s20, %s265_s25  }
  0x19   : > { %p3870_p5 = por %p276_p2, %p275_p0  ;;  %p3874_p6 = por %p282_p4, %p281_p3 }
  0x1a   : > { %4208 = sst [smem:[#allocation39_spill]] %s3866_s27  ;;  %p2300_p7 = scmp.ge.s32.totalorder %s3732_s21, 1 }
  0x1b   : > { %s4210_s29 = scalar_select %p3874_p6, 1, 0 }
  0x1c   : > { %p399_p8 = scmp.lt.s32.totalorder %s3732_s21, 7  ;;  %p2301_p9 = scmp.ne.s32.totalorder %s3849_s22, 0 }
  0x1d   : > { %4211 = sst [smem:[#allocation40_spill]] %s4210_s29  ;;  %p3218_p10 = scmp.eq.s32.totalorder %s3849_s22, 0 }
  0x1e   : > { %p3882_p11 = pnand %p2300_p7, %p399_p8  ;;  %s4213_s4 = sld [smem:[#allocation42_spill]] }
  0x1f   : > { %s3734_s26 = smov [#allocation9]   ;;  %s4214_s6 = sld [smem:[#allocation43_spill]] }
  0x20   : > { %p3192_p12 = pneg %p3882_p11  ;;  %s428_s23 = sshll.u32 %s3734_s26, 4  ;;  %s429_s23 = int_to_ptr.vmem [resolvable:$true] %s428_s23 }
  0x21   : > { %s3735_s16 = smov [#allocation12]   ;;  %s3736_s26 = smov 256  }
  0x22   : > { %p3896_p13 = pnand %p3218_p10, %p3192_p12  ;;  %s451_s17 = sshll.u32 %s3735_s16, 4  ;;  %s452_s17 = int_to_ptr.vmem [resolvable:$true] %s451_s17 }
  0x23   : > { %s4216_s2 = sld [smem:[#allocation41_spill]]  ;;  %s3738_s18 = smov [#allocation6]  }
  0x24   : > { %s426_s25 = sshll.u32 %s4213_s4, 4  ;;  %s3737_s4 = smov 16   ;;  %s427_s25 = int_to_ptr.hbm [resolvable:$true] %s426_s25 }
  0x25   : > { %s449_s24 = sshll.u32 %s4214_s6, 4  ;;  %s413_s21 = sshll.u32 %s3738_s18, 4  ;;  %s450_s24 = int_to_ptr.hbm [resolvable:$true] %s449_s24  ;;  %s414_s21 = int_to_ptr.vmem [resolvable:$true] %s413_s21 }
  0x26   : > { %3198 = dma.hbm_to_vmem [thread:$0]  (!%p3896_p13), %s427_s25, 128, %s429_s23, [#allocation10]  }
  0x27   : > { %3204 = dma.hbm_to_vmem [thread:$0]  (!%p3896_p13), %s450_s24, 12288, %s452_s17, [#allocation13], %s3736_s26, %s3736_s26, %s3737_s4  }
  0x28   : > { %s438_s16 = sshll.u32 %s4177_s5, 4  ;;  %s3739_s23 = smov [#allocation11]   ;;  %s439_s16 = int_to_ptr.hbm [resolvable:$true] %s438_s16 }
  0x29   : > { %s411_s6 = sshll.u32 %s4216_s2, 4  ;;  %s440_s25 = sshll.u32 %s3739_s23, 4  ;;  %s412_s6 = int_to_ptr.hbm [resolvable:$true] %s411_s6  ;;  %s441_s25 = int_to_ptr.vmem [resolvable:$true] %s440_s25 }
  0x2a   : > { %3195 = dma.hbm_to_vmem [thread:$0]  (!%p3896_p13), %s412_s6, 128, %s414_s21, [#allocation7]  }
  0x2b   : > { %s466_s20 = sshll.u32 %s4180_s8, 4  ;;  %s481_s2 = sshll.u32 %s4181_s9, 4  ;;  %s467_s20 = int_to_ptr.hbm [resolvable:$true] %s466_s20  ;;  %s482_s2 = int_to_ptr.hbm [resolvable:$true] %s481_s2 }
  0x2c   : > { %3201 = dma.hbm_to_vmem [thread:$0]  (!%p3896_p13), %s439_s16, 128, %s441_s25, [#allocation10]  }
  0x2d   : > { %s3740_s10 = smov [#allocation14]   ;;  %s3741_s6 = smov [#allocation15]  }
  0x2e   : > { %s468_s14 = sshll.u32 %s3740_s10, 4  ;;  %s483_s21 = sshll.u32 %s3741_s6, 4  ;;  %s469_s14 = int_to_ptr.vmem [resolvable:$true] %s468_s14  ;;  %s484_s21 = int_to_ptr.vmem [resolvable:$true] %s483_s21 }
  0x2f   : > { %3207 = dma.hbm_to_vmem [thread:$0]  (!%p3896_p13), %s467_s20, 8192, %s469_s14, [#allocation13], %s3736_s26, %s3736_s26, %s3737_s4  }
  0x30   : > { %3210 = dma.hbm_to_vmem [thread:$0]  (!%p3896_p13), %s482_s2, 64, %s484_s21, [#allocation16]  }
  0x31   : > { %510 = sbr.rel (%p3882_p11) target bundleno = 592 (0x250), region = 60 }
  0x36   : > { %3683 = dma.done.wait (%p3218_p10), [#allocation7], 128  }
  0x37   : > { %3685 = vsyncadd (%p3218_p10), [#allocation7], 4294967168 }
  0x38   : > { %3687 = dma.done.wait (%p3218_p10), [#allocation10], 256  }
  0x39   : > { %3689 = vsyncadd (%p3218_p10), [#allocation10], 4294967040 }
  0x3a   : > { %3691 = dma.done.wait (%p3218_p10), [#allocation13], 20480  }
  0x3b   : > { %3693 = vsyncadd (%p3218_p10), [#allocation13], 4294946816 }
  0x3c   : > { %3695 = dma.done.wait (%p3218_p10), [#allocation16], 64  }
  0x3d   : > { %3697 = vsyncadd (%p3218_p10), [#allocation16], 4294967232  ;;  %s4197_s2 = sand.u32 1, %s3724_s19   ;;  %p592_p0 = scmp.lt.s32.totalorder %s3849_s22, 5 }
  0x3e   : > { %s3946_s4 = sshll.u32 %s4197_s2, 3  ;;  %603 = sbr.rel (%p2301_p9) target bundleno = 72 (0x48), region = 88 }
  0x3f   : > { %s593_s29 = scalar_select %p592_p0, %s3849_s22, 5 }
  0x40   : > { %s583_s18 = scalar_lea.vmem [#allocation18], %s3946_s4 }
  0x41   : > { %s2317_s30 = sshll.u32 %s593_s29, 3 }
  0x42   : > { %s595_s23 = scalar_lea.vmem %s4172_s0, %s2317_s30  ;;  %s3955_s17 = scalar_lea.vmem %s4173_s1, %s2317_s30 }
  0x43   : > { %v604_v0 = vld [vmem:[#allocation6] sm:$0xff]  ;;  %v608_v2 = vld [vmem:[#allocation9] sm:$0xff]  ;;  %v610_v3 = vld [vmem:[#allocation11] sm:$0xff] }
  0x44   : > { %v606_v1 = vld [vmem:[%s4175_s3] sm:$0xff]  ;;  %605 = vst [vmem:[#allocation2] sm:$0xff] %v604_v0 }
  0x45   : > { %607 = vst [vmem:[#allocation3] sm:$0xff] %v606_v1 }
  0x46   : > { %609 = vst [vmem:[#allocation4] sm:$0xff] %v608_v2 }
  0x47   : > { %611 = vst [vmem:[#allocation5] sm:$0xff] %v610_v3 }
  0x48 PF: > { %v612_v4 = vld [vmem:[%s595_s23] sm:$0xff]  ;;  %v2562_v5 = vld [vmem:[#allocation12 + $0x1e0] sm:$0xf]  ;;  %v3050_v6 = vld [vmem:[#allocation12 + $0x1ec] sm:$0xf0]  ;;  %v3742_v7 = vmov 0  }
  0x49   : > { %3285 = vset.pattern.permute.xlu0 %v3742_v7  ;;  %v2563_v8 = vor.u32 %v3050_v6, %v2562_v5  ;;  %v2546_v9 = vld [vmem:[#allocation12 + $0x1c0] sm:$0xf]  ;;  %v3046_v10 = vld [vmem:[#allocation12 + $0x1cc] sm:$0xf0]  ;;  %v3016_v28 = vld [vmem:[#allocation12 + $0xe4] sm:$0xf] }
  0x4a   : > { %616 = vperm.xlu0 %3285, %v612_v4   ;;  %v2547_v11 = vor.u32 %v3046_v10, %v2546_v9  ;;  %v2690_v12 = vld [vmem:[#allocation12 + $0x2e0] sm:$0xf]  ;;  %v3042_v14 = vld [vmem:[#allocation12 + $0x1ac] sm:$0xf0]  ;;  %v2436_v29 = vld [vmem:[#allocation12 + $0xf0] sm:$0xf0] }
  0x4b   : > { %1224 = vmatpush.bf16.msra.mxu1 %v2563_v8  ;;  %v2530_v13 = vld [vmem:[#allocation12 + $0x1a0] sm:$0xf]  ;;  %v3082_v15 = vld [vmem:[#allocation12 + $0x2ec] sm:$0xf0]  ;;  %v2439_v34 = vor.u32 %v3016_v28, %v2436_v29  ;;  %v3012_v40 = vld [vmem:[#allocation12 + $0xc4] sm:$0xf] }
  0x4c   : > { %v2691_v16 = vor.u32 %v3082_v15, %v2690_v12  ;;  %v2674_v17 = vld [vmem:[#allocation12 + $0x2c0] sm:$0xf]  ;;  %v3078_v18 = vld [vmem:[#allocation12 + $0x2cc] sm:$0xf0]  ;;  %v2531_v19 = vor.u32 %v3042_v14, %v2530_v13  ;;  %v2420_v41 = vld [vmem:[#allocation12 + $0xd0] sm:$0xf0] }
  0x4d   : > { %v2514_v20 = vld [vmem:[#allocation12 + $0x180] sm:$0xf]  ;;  %v2675_v21 = vor.u32 %v3078_v18, %v2674_v17  ;;  %v3038_v22 = vld [vmem:[#allocation12 + $0x18c] sm:$0xf0]  ;;  %1250 = vmatpush.bf16.msra.mxu3 %v2439_v34  ;;  %v2423_v42 = vor.u32 %v3012_v40, %v2420_v41  ;;  %v3008_v49 = vld [vmem:[#allocation12 + $0xa4] sm:$0xf] }
  0x4e   : > { %1237 = vmatpush.bf16.msra.mxu2 %v2691_v16  ;;  %v2658_v23 = vld [vmem:[#allocation12 + $0x2a0] sm:$0xf]  ;;  %v3074_v24 = vld [vmem:[#allocation12 + $0x2ac] sm:$0xf0]  ;;  %v2515_v30 = vor.u32 %v3038_v22, %v2514_v20  ;;  %v2404_v53 = vld [vmem:[#allocation12 + $0xb0] sm:$0xf0] }
  0x4f   : > { %1225 = vmatpush.bf16.msra.mxu1 %v2547_v11  ;;  %v2434_v25 = vld [vmem:[#allocation12 + $0xe0] sm:$0xf]  ;;  %v3018_v26 = vld [vmem:[#allocation12 + $0xec] sm:$0xf0]  ;;  %v2659_v33 = vor.u32 %v3074_v24, %v2658_v23  ;;  %v2407_v54 = vor.u32 %v3008_v49, %v2404_v53  ;;  %v3004_v57 = vld [vmem:[#allocation12 + $0x84] sm:$0xf] }
  0x50   : > { %v2435_v27 = vor.u32 %v3018_v26, %v2434_v25  ;;  %v2498_v31 = vld [vmem:[#allocation12 + $0x160] sm:$0xf]  ;;  %v3034_v32 = vld [vmem:[#allocation12 + $0x16c] sm:$0xf0]  ;;  %v2388_v58 = vld [vmem:[#allocation12 + $0x90] sm:$0xf0] }
  0x51   : > { %v2418_v35 = vld [vmem:[#allocation12 + $0xc0] sm:$0xf]  ;;  %v3070_v37 = vld [vmem:[#allocation12 + $0x28c] sm:$0xf0]  ;;  %v2499_v45 = vor.u32 %v3034_v32, %v2498_v31  ;;  %1251 = vmatpush.bf16.msra.mxu3 %v2423_v42  ;;  %v2391_v2 = vor.u32 %v3004_v57, %v2388_v58  ;;  %v3000_v5 = vld [vmem:[#allocation12 + $0x64] sm:$0xf] }
  0x52   : > { %1238 = vmatpush.bf16.msra.mxu2 %v2675_v21  ;;  %v2642_v36 = vld [vmem:[#allocation12 + $0x280] sm:$0xf]  ;;  %1211 = vmatpush.bf16.msra.mxu0 %v2435_v27  ;;  %v3014_v38 = vld [vmem:[#allocation12 + $0xcc] sm:$0xf0]  ;;  %v2372_v6 = vld [vmem:[#allocation12 + $0x70] sm:$0xf0] }
  0x53   : > { %1226 = vmatpush.bf16.msra.mxu1 %v2531_v19  ;;  %v2419_v39 = vor.u32 %v3014_v38, %v2418_v35  ;;  %v2402_v43 = vld [vmem:[#allocation12 + $0xa0] sm:$0xf]  ;;  %v3010_v44 = vld [vmem:[#allocation12 + $0xac] sm:$0xf0]  ;;  %v2643_v48 = vor.u32 %v3070_v37, %v2642_v36  ;;  %v3080_v11 = vld [vmem:[#allocation12 + $0x2e4] sm:$0xf]  ;;  %v2375_v16 = vor.u32 %v3000_v5, %v2372_v6 }
  0x54   : > { %v2482_v46 = vld [vmem:[#allocation12 + $0x140] sm:$0xf]  ;;  %v3030_v47 = vld [vmem:[#allocation12 + $0x14c] sm:$0xf0]  ;;  %v2403_v52 = vor.u32 %v3010_v44, %v2402_v43  ;;  %v2692_v15 = vld [vmem:[#allocation12 + $0x2f0] sm:$0xf0] }
  0x55   : > { %v2626_v50 = vld [vmem:[#allocation12 + $0x260] sm:$0xf]  ;;  %v3066_v51 = vld [vmem:[#allocation12 + $0x26c] sm:$0xf0]  ;;  %v2483_v59 = vor.u32 %v3030_v47, %v2482_v46  ;;  %1252 = vmatpush.bf16.msra.mxu3 %v2407_v54  ;;  %v2996_v19 = vld [vmem:[#allocation12 + $0x44] sm:$0xf]  ;;  %v2695_v25 = vor.u32 %v3080_v11, %v2692_v15 }
  0x56   : > { %1239 = vmatpush.bf16.msra.mxu2 %v2659_v33  ;;  %1212 = vmatpush.bf16.msra.mxu0 %v2419_v39  ;;  %v2386_v55 = vld [vmem:[#allocation12 + $0x80] sm:$0xf]  ;;  %v3006_v56 = vld [vmem:[#allocation12 + $0x8c] sm:$0xf0]  ;;  %v2627_v61 = vor.u32 %v3066_v51, %v2626_v50  ;;  %v2356_v20 = vld [vmem:[#allocation12 + $0x50] sm:$0xf0] }
  0x57   : > { %1227 = vmatpush.bf16.msra.mxu1 %v2515_v30  ;;  %v2466_v60 = vld [vmem:[#allocation12 + $0x120] sm:$0xf]  ;;  %v3026_v62 = vld [vmem:[#allocation12 + $0x12c] sm:$0xf0]  ;;  %v2387_v1 = vor.u32 %v3006_v56, %v2386_v55  ;;  %v3076_v22 = vld [vmem:[#allocation12 + $0x2c4] sm:$0xf]  ;;  %v2359_v32 = vor.u32 %v2996_v19, %v2356_v20 }
  0x58   : > { %v2610_v63 = vld [vmem:[#allocation12 + $0x240] sm:$0xf]  ;;  %v3062_v0 = vld [vmem:[#allocation12 + $0x24c] sm:$0xf0]  ;;  %v2467_v7 = vor.u32 %v3026_v62, %v2466_v60  ;;  %v621_v24 = vld [vmem:[%s3955_s17] sm:$0xff]  ;;  %s2064_s30 = sshll.u32 %s4185_s13, 4  ;;  %s2065_s30 = int_to_ptr.hbm [resolvable:$true] %s2064_s30 }
  0x59   : > { %v2370_v3 = vld [vmem:[#allocation12 + $0x60] sm:$0xf]  ;;  %v3002_v4 = vld [vmem:[#allocation12 + $0x6c] sm:$0xf0]  ;;  %v2611_v10 = vor.u32 %v3062_v0, %v2610_v63  ;;  %1253 = vmatpush.bf16.msra.mxu3 %v2391_v2  ;;  %v2676_v26 = vld [vmem:[#allocation12 + $0x2d0] sm:$0xf0]  ;;  %v3965_v37 = vpack.c.bf16 %v621_v24, %v621_v24 }
  0x5a   : > { %1240 = vmatpush.bf16.msra.mxu2 %v2643_v48  ;;  %1213 = vmatpush.bf16.msra.mxu0 %v2403_v52  ;;  %v2450_v8 = vld [vmem:[#allocation12 + $0x100] sm:$0xf]  ;;  %v3022_v9 = vld [vmem:[#allocation12 + $0x10c] sm:$0xf0]  ;;  %v2371_v14 = vor.u32 %v3002_v4, %v2370_v3  ;;  %v2442_v30 = vld [vmem:[#allocation12 + $0xe8] sm:$0xf]  ;;  %v2679_v39 = vor.u32 %v3076_v22, %v2676_v26 }
  0x5b   : > { %1228 = vmatpush.bf16.msra.mxu1 %v2499_v45  ;;  %v2594_v12 = vld [vmem:[#allocation12 + $0x220] sm:$0xf]  ;;  %v3058_v13 = vld [vmem:[#allocation12 + $0x22c] sm:$0xf0]  ;;  %v2451_v21 = vor.u32 %v3022_v9, %v2450_v8  ;;  %v3019_v31 = vld [vmem:[#allocation12 + $0xf4] sm:$0xf0] }
  0x5c   : > { %v2354_v17 = vld [vmem:[#allocation12 + $0x40] sm:$0xf]  ;;  %v2998_v18 = vld [vmem:[#allocation12 + $0x4c] sm:$0xf0]  ;;  %v2595_v23 = vor.u32 %v3058_v13, %v2594_v12  ;;  %v2992_v35 = vld [vmem:[#allocation12 + $0x24] sm:$0xf]  ;;  %v2443_v42 = vor.u32 %v3019_v31, %v2442_v30 }
  0x5d   : > { %v2578_v27 = vld [vmem:[#allocation12 + $0x200] sm:$0xf]  ;;  %v3054_v28 = vld [vmem:[#allocation12 + $0x20c] sm:$0xf0]  ;;  %v2355_v29 = vor.u32 %v2998_v18, %v2354_v17  ;;  %1254 = vmatpush.bf16.msra.mxu3 %v2375_v16  ;;  %v2340_v36 = vld [vmem:[#allocation12 + $0x30] sm:$0xf0] }
  0x5e   : > { %1241 = vmatpush.bf16.msra.mxu2 %v2627_v61  ;;  %1214 = vmatpush.bf16.msra.mxu0 %v2387_v1  ;;  %v2338_v33 = vld [vmem:[#allocation12 + $0x20] sm:$0xf]  ;;  %v2994_v34 = vld [vmem:[#allocation12 + $0x2c] sm:$0xf0]  ;;  %v2579_v38 = vor.u32 %v3054_v28, %v2578_v27  ;;  %v3072_v40 = vld [vmem:[#allocation12 + $0x2a4] sm:$0xf]  ;;  %v2343_v46 = vor.u32 %v2992_v35, %v2340_v36 }
  0x5f   : > { %1229 = vmatpush.bf16.msra.mxu1 %v2483_v59  ;;  %v2660_v41 = vld [vmem:[#allocation12 + $0x2b0] sm:$0xf0]  ;;  %v2426_v43 = vld [vmem:[#allocation12 + $0xc8] sm:$0xf]  ;;  %v3015_v44 = vld [vmem:[#allocation12 + $0xd4] sm:$0xf0]  ;;  %v2339_v45 = vor.u32 %v2994_v34, %v2338_v33 }
  0x60   : > { %v2322_v47 = vld [vmem:[#allocation12] sm:$0xf]  ;;  %v2990_v48 = vld [vmem:[#allocation12 + $0xc] sm:$0xf0]  ;;  %v2988_v49 = vld [vmem:[#allocation12 + $0x4] sm:$0xf]  ;;  %v2663_v55 = vor.u32 %v3072_v40, %v2660_v41  ;;  %v2427_v57 = vor.u32 %v3015_v44, %v2426_v43 }
  0x61   : > { %1255 = vmatpush.bf16.msra.mxu3 %v2359_v32  ;;  %v2324_v50 = vld [vmem:[#allocation12 + $0x10] sm:$0xf0]  ;;  %v3048_v51 = vld [vmem:[#allocation12 + $0x1e4] sm:$0xf]  ;;  %v2570_v53 = vld [vmem:[#allocation12 + $0x1e8] sm:$0xf]  ;;  %v2323_v61 = vor.u32 %v2990_v48, %v2322_v47 }
  0x62   : > { %1242 = vmatpush.bf16.msra.mxu2 %v2611_v10  ;;  %1215 = vmatpush.bf16.msra.mxu0 %v2371_v14  ;;  %v2564_v52 = vld [vmem:[#allocation12 + $0x1f0] sm:$0xf0]  ;;  %v3051_v54 = vld [vmem:[#allocation12 + $0x1f4] sm:$0xf0]  ;;  %v3068_v56 = vld [vmem:[#allocation12 + $0x284] sm:$0xf]  ;;  %v2327_v62 = vor.u32 %v2988_v49, %v2324_v50 }
  0x63   : > { %1230 = vmatpush.bf16.msra.mxu1 %v2467_v7  ;;  %v2644_v58 = vld [vmem:[#allocation12 + $0x290] sm:$0xf0]  ;;  %v2410_v59 = vld [vmem:[#allocation12 + $0xa8] sm:$0xf]  ;;  %v3011_v60 = vld [vmem:[#allocation12 + $0xb4] sm:$0xf0]  ;;  %v2567_v63 = vor.u32 %v3048_v51, %v2564_v52  ;;  %v2571_v0 = vor.u32 %v3051_v54, %v2570_v53 }
  0x64   : > { %v3044_v1 = vld [vmem:[#allocation12 + $0x1c4] sm:$0xf]  ;;  %v2548_v2 = vld [vmem:[#allocation12 + $0x1d0] sm:$0xf0]  ;;  %v2554_v3 = vld [vmem:[#allocation12 + $0x1c8] sm:$0xf]  ;;  %v2647_v5 = vor.u32 %v3068_v56, %v2644_v58  ;;  %v2411_v8 = vor.u32 %v3011_v60, %v2410_v59 }
  0x65   : > { %1256 = vmatpush.bf16.msra.mxu3 %v2343_v46  ;;  %v3047_v4 = vld [vmem:[#allocation12 + $0x1d4] sm:$0xf0]  ;;  %v3064_v6 = vld [vmem:[#allocation12 + $0x264] sm:$0xf]  ;;  %v2628_v7 = vld [vmem:[#allocation12 + $0x270] sm:$0xf0]  ;;  %v2551_v12 = vor.u32 %v3044_v1, %v2548_v2 }
  0x66   : > { %1243 = vmatpush.bf16.msra.mxu2 %v2595_v23  ;;  %1216 = vmatpush.bf16.msra.mxu0 %v2355_v29  ;;  %v2394_v9 = vld [vmem:[#allocation12 + $0x88] sm:$0xf]  ;;  %v3007_v10 = vld [vmem:[#allocation12 + $0x94] sm:$0xf0]  ;;  %v2555_v13 = vor.u32 %v3047_v4, %v2554_v3  ;;  %v3040_v14 = vld [vmem:[#allocation12 + $0x1a4] sm:$0xf]  ;;  %v2631_v19 = vor.u32 %v3064_v6, %v2628_v7 }
  0x67   : > { %1231 = vmatpush.bf16.msra.mxu1 %v2451_v21  ;;  %v623_v11 = vld [vmem:[#allocation2] sm:$0xff]  ;;  %v2532_v16 = vld [vmem:[#allocation12 + $0x1b0] sm:$0xf0]  ;;  %v3043_v18 = vld [vmem:[#allocation12 + $0x1b4] sm:$0xf0]  ;;  %v2395_v21 = vor.u32 %v3007_v10, %v2394_v9  ;;  %s3744_s26 = smov [#allocation21]  }
  0x68   : > { %v3968_v15 = vpack.c.bf16 %v623_v11, %v623_v11  ;;  %v2538_v17 = vld [vmem:[#allocation12 + $0x1a8] sm:$0xf]  ;;  %v3060_v20 = vld [vmem:[#allocation12 + $0x244] sm:$0xf]  ;;  %v2612_v22 = vld [vmem:[#allocation12 + $0x250] sm:$0xf0] }
  0x69   : > { %1257 = vmatpush.bf16.msra.mxu3 %v2327_v62  ;;  %v2378_v23 = vld [vmem:[#allocation12 + $0x68] sm:$0xf]  ;;  %v3003_v24 = vld [vmem:[#allocation12 + $0x74] sm:$0xf0]  ;;  %v2539_v26 = vor.u32 %v3043_v18, %v2538_v17  ;;  %v3036_v27 = vld [vmem:[#allocation12 + $0x184] sm:$0xf]  ;;  %v2615_v31 = vor.u32 %v3060_v20, %v2612_v22 }
  0x6a   : > { %1232 = vmatmul.bf16.vlgmr.msra.gmra.mxu1 %v3965_v37  ;;  %1244 = vmatpush.bf16.msra.mxu2 %v2579_v38  ;;  %v2516_v28 = vld [vmem:[#allocation12 + $0x190] sm:$0xf0]  ;;  %v2522_v29 = vld [vmem:[#allocation12 + $0x188] sm:$0xf]  ;;  %v3039_v30 = vld [vmem:[#allocation12 + $0x194] sm:$0xf0]  ;;  %v2379_v33 = vor.u32 %v3003_v24, %v2378_v23 }
  0x6b   : > { %1276 = vmatpush.bf16.msrb.mxu1 %v2695_v25  ;;  %1217 = vmatpush.bf16.msra.mxu0 %v2339_v45  ;;  %v2535_v25 = vor.u32 %v3040_v14, %v2532_v16  ;;  %v3056_v32 = vld [vmem:[#allocation12 + $0x224] sm:$0xf]  ;;  %v2596_v34 = vld [vmem:[#allocation12 + $0x230] sm:$0xf0]  ;;  %v2362_v35 = vld [vmem:[#allocation12 + $0x48] sm:$0xf]  ;;  %v2519_v38 = vor.u32 %v3036_v27, %v2516_v28 }
  0x6c   : > { %v2999_v36 = vld [vmem:[#allocation12 + $0x54] sm:$0xf0]  ;;  %v3032_v40 = vld [vmem:[#allocation12 + $0x164] sm:$0xf]  ;;  %v2500_v41 = vld [vmem:[#allocation12 + $0x170] sm:$0xf0]  ;;  %v2599_v44 = vor.u32 %v3056_v32, %v2596_v34 }
  0x6d   : > { %1302 = vmatpush.bf16.msrb.mxu3 %v2571_v0  ;;  %1245 = vmatmul.bf16.vlgmr.msra.gmra.mxu2 %v3968_v15  ;;  %v3035_v43 = vld [vmem:[#allocation12 + $0x174] sm:$0xf0]  ;;  %v3052_v45 = vld [vmem:[#allocation12 + $0x204] sm:$0xf]  ;;  %v2363_v46 = vor.u32 %v2999_v36, %v2362_v35  ;;  %v2580_v47 = vld [vmem:[#allocation12 + $0x210] sm:$0xf0]  ;;  %v2503_v52 = vor.u32 %v3032_v40, %v2500_v41 }
  0x6e   : > { %1289 = vmatpush.bf16.msrb.mxu2 %v2443_v42  ;;  %v2506_v42 = vld [vmem:[#allocation12 + $0x168] sm:$0xf]  ;;  %v2995_v49 = vld [vmem:[#allocation12 + $0x34] sm:$0xf0]  ;;  %v3017_v50 = vld [vmem:[#allocation12 + $0xec] sm:$0xf]  ;;  %v2583_v58 = vor.u32 %v3052_v45, %v2580_v47 }
  0x6f   : > { %1277 = vmatpush.bf16.msrb.mxu1 %v2679_v39  ;;  %1218 = vmatpush.bf16.msra.mxu0 %v2323_v61  ;;  %v2523_v39 = vor.u32 %v3039_v30, %v2522_v29  ;;  %v2346_v48 = vld [vmem:[#allocation12 + $0x28] sm:$0xf]  ;;  %v2444_v51 = vld [vmem:[#allocation12 + $0xf8] sm:$0xf0]  ;;  %v2507_v53 = vor.u32 %v3035_v43, %v2506_v42  ;;  %v3028_v54 = vld [vmem:[#allocation12 + $0x144] sm:$0xf] }
  0x70   : > { %v2490_v56 = vld [vmem:[#allocation12 + $0x148] sm:$0xf]  ;;  %v3013_v59 = vld [vmem:[#allocation12 + $0xcc] sm:$0xf]  ;;  %v2347_v60 = vor.u32 %v2995_v49, %v2346_v48  ;;  %v2447_v61 = vor.u32 %v3017_v50, %v2444_v51  ;;  %v2428_v62 = vld [vmem:[#allocation12 + $0xd8] sm:$0xf0] }
  0x71   : > { %1303 = vmatpush.bf16.msrb.mxu3 %v2555_v13  ;;  %v2991_v0 = vld [vmem:[#allocation12 + $0x14] sm:$0xf0]  ;;  %v3049_v1 = vld [vmem:[#allocation12 + $0x1ec] sm:$0xf]  ;;  %v2572_v2 = vld [vmem:[#allocation12 + $0x1f8] sm:$0xf0]  ;;  %v2431_v10 = vor.u32 %v3013_v59, %v2428_v62 }
  0x72   : > { %1290 = vmatpush.bf16.msrb.mxu2 %v2427_v57  ;;  %v3031_v57 = vld [vmem:[#allocation12 + $0x154] sm:$0xf0]  ;;  %v2468_v6 = vld [vmem:[#allocation12 + $0x130] sm:$0xf0]  ;;  %v2474_v7 = vld [vmem:[#allocation12 + $0x128] sm:$0xf] }
  0x73   : > { %1278 = vmatpush.bf16.msrb.mxu1 %v2663_v55  ;;  %1263 = vmatpush.bf16.msrb.mxu0 %v2567_v63  ;;  %v2484_v55 = vld [vmem:[#allocation12 + $0x150] sm:$0xf0]  ;;  %v2330_v63 = vld [vmem:[#allocation12 + $0x8] sm:$0xf]  ;;  %v2491_v4 = vor.u32 %v3031_v57, %v2490_v56  ;;  %v3009_v11 = vld [vmem:[#allocation12 + $0xac] sm:$0xf] }
  0x74   : > { %v2487_v3 = vor.u32 %v3028_v54, %v2484_v55  ;;  %v2331_v9 = vor.u32 %v2991_v0, %v2330_v63  ;;  %v2412_v13 = vld [vmem:[#allocation12 + $0xb8] sm:$0xf0]  ;;  %v3045_v14 = vld [vmem:[#allocation12 + $0x1cc] sm:$0xf]  ;;  %v3020_v42 = vld [vmem:[#allocation12 + $0x104] sm:$0xf] }
  0x75   : > { %1304 = vmatpush.bf16.msrb.mxu3 %v2539_v26  ;;  %v2556_v16 = vld [vmem:[#allocation12 + $0x1d8] sm:$0xf0]  ;;  %v3005_v20 = vld [vmem:[#allocation12 + $0x8c] sm:$0xf]  ;;  %v2452_v43 = vld [vmem:[#allocation12 + $0x110] sm:$0xf0] }
  0x76   : > { %1291 = vmatpush.bf16.msrb.mxu2 %v2411_v8  ;;  %v3027_v8 = vld [vmem:[#allocation12 + $0x134] sm:$0xf0]  ;;  %v2396_v22 = vld [vmem:[#allocation12 + $0x98] sm:$0xf0]  ;;  %v3041_v23 = vld [vmem:[#allocation12 + $0x1ac] sm:$0xf]  ;;  %v2455_v45 = vor.u32 %v3020_v42, %v2452_v43 }
  0x77   : > { %1279 = vmatpush.bf16.msrb.mxu1 %v2647_v5  ;;  %1264 = vmatpush.bf16.msrb.mxu0 %v2551_v12  ;;  %v3024_v5 = vld [vmem:[#allocation12 + $0x124] sm:$0xf]  ;;  %v2575_v12 = vor.u32 %v3049_v1, %v2572_v2  ;;  %v2475_v18 = vor.u32 %v3027_v8, %v2474_v7  ;;  %v2540_v24 = vld [vmem:[#allocation12 + $0x1b8] sm:$0xf0]  ;;  %v3001_v26 = vld [vmem:[#allocation12 + $0x6c] sm:$0xf] }
  0x78   : > { %v2471_v17 = vor.u32 %v3024_v5, %v2468_v6  ;;  %v2543_v27 = vor.u32 %v3041_v23, %v2540_v24  ;;  %v2380_v28 = vld [vmem:[#allocation12 + $0x78] sm:$0xf0]  ;;  %v3037_v29 = vld [vmem:[#allocation12 + $0x18c] sm:$0xf]  ;;  %v3023_v47 = vld [vmem:[#allocation12 + $0x114] sm:$0xf0] }
  0x79   : > { %1305 = vmatpush.bf16.msrb.mxu3 %v2523_v39  ;;  %v2524_v30 = vld [vmem:[#allocation12 + $0x198] sm:$0xf0]  ;;  %v2993_v36 = vld [vmem:[#allocation12 + $0x2c] sm:$0xf]  ;;  %v2698_v63 = vld [vmem:[#allocation12 + $0x2e8] sm:$0xf] }
  0x7a   : > { %1292 = vmatpush.bf16.msrb.mxu2 %v2395_v21  ;;  %v2559_v21 = vor.u32 %v3045_v14, %v2556_v16  ;;  %v2527_v32 = vor.u32 %v3037_v29, %v2524_v30  ;;  %v2364_v34 = vld [vmem:[#allocation12 + $0x58] sm:$0xf0]  ;;  %v2989_v40 = vld [vmem:[#allocation12 + $0xc] sm:$0xf]  ;;  %v3083_v0 = vld [vmem:[#allocation12 + $0x2f4] sm:$0xf0] }
  0x7b   : > { %1280 = vmatpush.bf16.msrb.mxu1 %v2631_v19  ;;  %1265 = vmatpush.bf16.msrb.mxu0 %v2535_v25  ;;  %v2415_v19 = vor.u32 %v3009_v11, %v2412_v13  ;;  %v2399_v25 = vor.u32 %v3005_v20, %v2396_v22  ;;  %v2332_v41 = vld [vmem:[#allocation12 + $0x18] sm:$0xf0]  ;;  %v3033_v49 = vld [vmem:[#allocation12 + $0x16c] sm:$0xf]  ;;  %v2682_v6 = vld [vmem:[#allocation12 + $0x2c8] sm:$0xf] }
  0x7c   : > { %v2508_v50 = vld [vmem:[#allocation12 + $0x178] sm:$0xf0]  ;;  %v3025_v55 = vld [vmem:[#allocation12 + $0x12c] sm:$0xf]  ;;  %v3079_v7 = vld [vmem:[#allocation12 + $0x2d4] sm:$0xf0] }
  0x7d   : > { %1306 = vmatpush.bf16.msrb.mxu3 %v2507_v53  ;;  %v2511_v51 = vor.u32 %v3033_v49, %v2508_v50  ;;  %v2492_v53 = vld [vmem:[#allocation12 + $0x158] sm:$0xf0]  ;;  %v3081_v1 = vld [vmem:[#allocation12 + $0x2ec] sm:$0xf]  ;;  %v2683_v11 = vor.u32 %v3079_v7, %v2682_v6  ;;  %v2666_v13 = vld [vmem:[#allocation12 + $0x2a8] sm:$0xf] }
  0x7e   : > { %1293 = vmatpush.bf16.msrb.mxu2 %v2379_v33  ;;  %v2997_v33 = vld [vmem:[#allocation12 + $0x4c] sm:$0xf]  ;;  %v2476_v56 = vld [vmem:[#allocation12 + $0x138] sm:$0xf0]  ;;  %v3075_v14 = vld [vmem:[#allocation12 + $0x2b4] sm:$0xf0] }
  0x7f   : > { %1281 = vmatpush.bf16.msrb.mxu1 %v2615_v31  ;;  %1266 = vmatpush.bf16.msrb.mxu0 %v2519_v38  ;;  %v2383_v31 = vor.u32 %v3001_v26, %v2380_v28  ;;  %v2367_v35 = vor.u32 %v2997_v33, %v2364_v34  ;;  %v2348_v38 = vld [vmem:[#allocation12 + $0x38] sm:$0xf0]  ;;  %v2479_v57 = vor.u32 %v3025_v55, %v2476_v56  ;;  %v3077_v8 = vld [vmem:[#allocation12 + $0x2cc] sm:$0xf]  ;;  %v2650_v20 = vld [vmem:[#allocation12 + $0x288] sm:$0xf] }
  0x80   : > { %v2351_v39 = vor.u32 %v2993_v36, %v2348_v38  ;;  %v2460_v59 = vld [vmem:[#allocation12 + $0x118] sm:$0xf0]  ;;  %v3073_v16 = vld [vmem:[#allocation12 + $0x2ac] sm:$0xf]  ;;  %v2634_v26 = vld [vmem:[#allocation12 + $0x268] sm:$0xf] }
  0x81   : > { %1307 = vmatpush.bf16.msrb.mxu3 %v2491_v4  ;;  %v2700_v2 = vld [vmem:[#allocation12 + $0x2f8] sm:$0xf0]  ;;  %v2699_v4 = vor.u32 %v3083_v0, %v2698_v63  ;;  %v3069_v22 = vld [vmem:[#allocation12 + $0x28c] sm:$0xf]  ;;  %v3063_v33 = vld [vmem:[#allocation12 + $0x254] sm:$0xf0] }
  0x82   : > { %1294 = vmatpush.bf16.msrb.mxu2 %v2363_v46  ;;  %v2458_v46 = vld [vmem:[#allocation12 + $0x108] sm:$0xf]  ;;  %v2703_v5 = vor.u32 %v3081_v1, %v2700_v2  ;;  %v2652_v23 = vld [vmem:[#allocation12 + $0x298] sm:$0xf0]  ;;  %v3065_v28 = vld [vmem:[#allocation12 + $0x26c] sm:$0xf] }
  0x83   : > { %1282 = vmatpush.bf16.msrb.mxu1 %v2599_v44  ;;  %1267 = vmatpush.bf16.msrb.mxu0 %v2503_v52  ;;  %v2335_v44 = vor.u32 %v2989_v40, %v2332_v41  ;;  %v2459_v48 = vor.u32 %v3023_v47, %v2458_v46  ;;  %v3029_v52 = vld [vmem:[#allocation12 + $0x14c] sm:$0xf]  ;;  %v2636_v29 = vld [vmem:[#allocation12 + $0x278] sm:$0xf0]  ;;  %v3059_v40 = vld [vmem:[#allocation12 + $0x234] sm:$0xf0] }
  0x84   : > { %v2495_v54 = vor.u32 %v3029_v52, %v2492_v53  ;;  %v3061_v34 = vld [vmem:[#allocation12 + $0x24c] sm:$0xf]  ;;  %v2604_v42 = vld [vmem:[#allocation12 + $0x238] sm:$0xf0]  ;;  %v3055_v46 = vld [vmem:[#allocation12 + $0x214] sm:$0xf0] }
  0x85   : > { %1308 = vmatpush.bf16.msrb.mxu3 %v2475_v18  ;;  %v2667_v18 = vor.u32 %v3075_v14, %v2666_v13  ;;  %v3057_v41 = vld [vmem:[#allocation12 + $0x22c] sm:$0xf]  ;;  %v3144_v56 = vld [vmem:[#allocation14 + $0x1e4] sm:$0xf]  ;;  %v3114_v63 = vld [vmem:[#allocation14 + $0xec] sm:$0xf0] }
  0x86   : > { %1295 = vmatpush.bf16.msrb.mxu2 %v2347_v60  ;;  %v3053_v47 = vld [vmem:[#allocation12 + $0x20c] sm:$0xf]  ;;  %v3112_v0 = vld [vmem:[#allocation14 + $0xe4] sm:$0xf]  ;;  %v3146_v6 = vld [vmem:[#allocation14 + $0x1ec] sm:$0xf0] }
  0x87   : > { %1283 = vmatpush.bf16.msrb.mxu1 %v2583_v58  ;;  %1268 = vmatpush.bf16.msrb.mxu0 %v2487_v3  ;;  %v3021_v58 = vld [vmem:[#allocation12 + $0x10c] sm:$0xf]  ;;  %v3136_v7 = vld [vmem:[#allocation14 + $0x1a4] sm:$0xf]  ;;  %s2062_s16 = sshll.u32 %s3744_s26, 4  ;;  %s4198_s23 = sshll.u32 %s3849_s22, 3  ;;  %s2063_s16 = int_to_ptr.vmem [resolvable:$true] %s2062_s16 }
  0x88   : > { %v2463_v60 = vor.u32 %v3021_v58, %v2460_v59  ;;  %v3982_v59 = vld [vmem:[%s4179_s7] sm:$0xf]  ;;  %v3108_v13 = vld [vmem:[#allocation14 + $0xc4] sm:$0xf]  ;;  %s2011_s25 = sand.u32 1, %s3849_s22   ;;  %s2036_s27 = scalar_lea.hbm %s4183_s11, %s4198_s23 }
  0x89   : > { %1309 = vmatpush.bf16.msrb.mxu3 %v2459_v48  ;;  %v2588_v48 = vld [vmem:[#allocation12 + $0x218] sm:$0xf0]  ;;  %v723_v1 = vperm.slane %v3982_v59, 0  ;;  %s4079_s10 = sshll.u32 %s583_s18, 4  ;;  %s2040_s14 = sshll.u32 %s2036_s27, 4  ;;  %s2039_s10 = int_to_ptr.vmem [resolvable:$true] %s4079_s10  ;;  %s2041_s14 = int_to_ptr.hbm [resolvable:$true] %s2040_s14 }
  0x8a   : > { %1284 = vmatmul.bf16.vlgmr.msrb.gmra.mxu1 %v3968_v15  ;;  %1296 = vmatpush.bf16.msrb.mxu2 %v2331_v9  ;;  %v2684_v9 = vld [vmem:[#allocation12 + $0x2d8] sm:$0xf0]  ;;  %s3745_s6 = smov [#allocation20]   ;;  %s2052_s26 = sshll.u32 %s4184_s12, 4  ;;  %s2053_s26 = int_to_ptr.hbm [resolvable:$true] %s2052_s26 }
  0x8b   : > { %1328 = vmatpush.bf16.msra.mxu1 %v2447_v61  ;;  %1269 = vmatpush.bf16.msrb.mxu0 %v2471_v17  ;;  %v613_v61 = vlaneseq  ;;  %v2668_v17 = vld [vmem:[#allocation12 + $0x2b8] sm:$0xf0]  ;;  %s4081_s21 = sshll.u32 %s3745_s6, 4  ;;  %s2088_s20 = sshll.u32 %s4187_s15, 4  ;;  %s2051_s21 = int_to_ptr.vmem [resolvable:$true] %s4081_s21  ;;  %s2089_s20 = int_to_ptr.hbm [resolvable:$true] %s2088_s20 }
  0x8c   : > { %s2012_s27 = scalar_lea.sflag [#allocation19], %s2011_s25  ;;  %s3540_s6 = sshra.s32 %s2041_s14, 4  ;;  %s3541_s6 = int_to_ptr.hbm [resolvable:$true] %s3540_s6 }
  0x8d   : > { %v614_v62 = vand.u32 127, %v613_v61  ;;  %v2943_v61 = vld [vmem:[#allocation14 + $0x1d0] sm:$0xf0]  ;;  %s3542_s2 = scalar_lea.hbm %s3541_s6, 8  ;;  %p3547_p7 = scmp.lt.s32.totalorder %s3541_s6, %s4183_s11 }
  0x8e   : > { %1341 = vmatpush.bf16.msra.mxu2 %v2575_v12  ;;  %v2687_v12 = vor.u32 %v3077_v8, %v2684_v9  ;;  %v2927_v9 = vld [vmem:[#allocation14 + $0x1b0] sm:$0xf0]  ;;  %p3543_p1 = scmp.ne.s32.totalorder %s3541_s6, %s3542_s2 }
  0x8f   : > { %1329 = vmatpush.bf16.msra.mxu1 %v2431_v10  ;;  %1270 = vmatpush.bf16.msrb.mxu0 %v2455_v45  ;;  %v3743_v10 = vmov 1.0|1.0   ;;  %v2586_v45 = vld [vmem:[#allocation12 + $0x208] sm:$0xf] }
  0x90   : > { %v2587_v49 = vor.u32 %v3055_v46, %v2586_v45  ;;  %v2781_v46 = vld [vmem:[#allocation14 + $0x80] sm:$0xf]  ;;  %p3544_p3 = pnand %p3543_p1, %p3870_p5 }
  0x92   : > { %1342 = vmatpush.bf16.msra.mxu2 %v2559_v21  ;;  %v3071_v21 = vld [vmem:[#allocation12 + $0x294] sm:$0xf0]  ;;  %p3545_p4 = pneg %p3544_p3 }
  0x93   : > { %1330 = vmatpush.bf16.msra.mxu1 %v2415_v19  ;;  %v2671_v19 = vor.u32 %v3073_v16, %v2668_v17  ;;  %v2651_v24 = vor.u32 %v3071_v21, %v2650_v20  ;;  %v2815_v17 = vld [vmem:[#allocation14 + $0xd0] sm:$0xf0]  ;;  %v2941_v21 = vld [vmem:[#allocation14 + $0x1c0] sm:$0xf] }
  0x94   : > { %v2818_v20 = vor.u32 %v3108_v13, %v2815_v17 }
  0x96   : > { %1343 = vmatpush.bf16.msra.mxu2 %v2543_v27  ;;  %v3067_v27 = vld [vmem:[#allocation12 + $0x274] sm:$0xf0] }
  0x97   : > { %1331 = vmatpush.bf16.msra.mxu1 %v2399_v25  ;;  %v2655_v25 = vor.u32 %v3069_v22, %v2652_v23  ;;  %v2635_v30 = vor.u32 %v3067_v27, %v2634_v26  ;;  %v3142_v22 = vld [vmem:[#allocation14 + $0x1cc] sm:$0xf0]  ;;  %v3132_v23 = vld [vmem:[#allocation14 + $0x184] sm:$0xf] }
  0x9a   : > { %1344 = vmatpush.bf16.msra.mxu2 %v2527_v32  ;;  %v2618_v32 = vld [vmem:[#allocation12 + $0x248] sm:$0xf] }
  0x9b   : > { %1332 = vmatpush.bf16.msra.mxu1 %v2383_v31  ;;  %v2639_v31 = vor.u32 %v3065_v28, %v2636_v29  ;;  %v2619_v36 = vor.u32 %v3063_v33, %v2618_v32  ;;  %v2797_v28 = vld [vmem:[#allocation14 + $0xa0] sm:$0xf]  ;;  %v3106_v29 = vld [vmem:[#allocation14 + $0xac] sm:$0xf0]  ;;  %v2799_v32 = vld [vmem:[#allocation14 + $0xb0] sm:$0xf0] }
  0x9e   : > { %1345 = vmatpush.bf16.msra.mxu2 %v2511_v51 }
  0x9f   : > { %1333 = vmatpush.bf16.msra.mxu1 %v2367_v35  ;;  %v2620_v35 = vld [vmem:[#allocation12 + $0x258] sm:$0xf0] }
  0xa0   : > { %v2623_v38 = vor.u32 %v3061_v34, %v2620_v35 }
  0xa2   : > { %1346 = vmatpush.bf16.msra.mxu2 %v2495_v54 }
  0xa3   : > { %1334 = vmatpush.bf16.msra.mxu1 %v2351_v39  ;;  %v2602_v39 = vld [vmem:[#allocation12 + $0x228] sm:$0xf] }
  0xa4   : > { %v2603_v43 = vor.u32 %v3059_v40, %v2602_v39  ;;  %v3128_v39 = vld [vmem:[#allocation14 + $0x164] sm:$0xf] }
  0xa6   : > { %1347 = vmatpush.bf16.msra.mxu2 %v2479_v57  ;;  %v2959_v57 = vld [vmem:[#allocation14 + $0x1f0] sm:$0xf0] }
  0xa7   : > { %1335 = vmatpush.bf16.msra.mxu1 %v2335_v44  ;;  %v2607_v44 = vor.u32 %v3057_v41, %v2604_v42  ;;  %v2962_v58 = vor.u32 %v3144_v56, %v2959_v57  ;;  %v724_v56 = vperm.slane %v3982_v59, 1 }
  0xaa   : > { %1348 = vmatpush.bf16.msra.mxu2 %v2463_v60  ;;  %v3140_v60 = vld [vmem:[#allocation14 + $0x1c4] sm:$0xf] }
  0xbc   : > { %v617_v3 = vpop.permute.xlu0 %616 }
  0xbd   : > { %vm618_vm0 = vcmp.eq.s32.totalorder %v614_v62, %v617_v3  ;;  %v2946_v62 = vor.u32 %v3140_v60, %v2943_v61  ;;  %v2831_v3 = vld [vmem:[#allocation14 + $0xf0] sm:$0xf0]  ;;  %v2765_v61 = vld [vmem:[#allocation14 + $0x60] sm:$0xf] }
  0xbe   : > { %vm2704_vm1 = vmpackc.low %vm618_vm0, %vm618_vm0 }
  0xbf   : > { %2705 = vmatmul.msk.bf16.vlgmr.msra.gmra.mxu0 %vm2704_vm1, %v3743_v10  ;;  %2707 = vmatmul.msk.bf16.vlgmr.msra.gmra.mxu3 %vm2704_vm1, %v3743_v10 }
  0xc0   : > { %2709 = vmatmul.msk.bf16.vlgmr.msrb.gmra.mxu2 %vm2704_vm1, %v3743_v10  ;;  %2711 = vmatmul.msk.bf16.vlgmr.msra.gmra.mxu1 %vm2704_vm1, %v3743_v10  ;;  %v2930_v10 = vor.u32 %v3136_v7, %v2927_v9 }
  0xc1   : > { %1315 = vmatpush.bf16.msra.mxu0 %v2699_v4  ;;  %1354 = vmatpush.bf16.msra.mxu3 %v2703_v5  ;;  %v2834_v4 = vor.u32 %v3112_v0, %v2831_v3  ;;  %v2957_v5 = vld [vmem:[#allocation14 + $0x1e0] sm:$0xf]  ;;  %v2767_v0 = vld [vmem:[#allocation14 + $0x70] sm:$0xf0] }
  0xc2   : > { %v2958_v8 = vor.u32 %v3146_v6, %v2957_v5  ;;  %v2893_v3 = vld [vmem:[#allocation14 + $0x160] sm:$0xf]  ;;  %v3120_v5 = vld [vmem:[#allocation14 + $0x124] sm:$0xf] }
  0xc3   : > { %1854 = vmatpush.bf16.msrb.mxu2 %v2834_v4  ;;  %v3130_v4 = vld [vmem:[#allocation14 + $0x16c] sm:$0xf0] }
  0xc4   : > { %1841 = vmatpush.bf16.msrb.mxu1 %v2958_v8  ;;  %v2894_v9 = vor.u32 %v3130_v4, %v2893_v3  ;;  %v2965_v4 = vld [vmem:[#allocation14 + $0x1e8] sm:$0xf] }
  0xc5   : > { %1316 = vmatpush.bf16.msra.mxu0 %v2683_v11  ;;  %1355 = vmatpush.bf16.msra.mxu3 %v2687_v12  ;;  %v2813_v11 = vld [vmem:[#allocation14 + $0xc0] sm:$0xf]  ;;  %v3110_v12 = vld [vmem:[#allocation14 + $0xcc] sm:$0xf0] }
  0xc6   : > { %v2814_v16 = vor.u32 %v3110_v12, %v2813_v11 }
  0xc7   : > { %1855 = vmatpush.bf16.msrb.mxu2 %v2818_v20  ;;  %v3092_v20 = vld [vmem:[#allocation14 + $0x44] sm:$0xf] }
  0xc9   : > { %1317 = vmatpush.bf16.msra.mxu0 %v2667_v18  ;;  %1356 = vmatpush.bf16.msra.mxu3 %v2671_v19 }
  0xcd   : > { %1318 = vmatpush.bf16.msra.mxu0 %v2651_v24  ;;  %1357 = vmatpush.bf16.msra.mxu3 %v2655_v25  ;;  %v2942_v24 = vor.u32 %v3142_v22, %v2941_v21  ;;  %v2911_v25 = vld [vmem:[#allocation14 + $0x190] sm:$0xf0]  ;;  %v2877_v22 = vld [vmem:[#allocation14 + $0x140] sm:$0xf] }
  0xce   : > { %v2914_v27 = vor.u32 %v3132_v23, %v2911_v25  ;;  %v2751_v21 = vld [vmem:[#allocation14 + $0x50] sm:$0xf0]  ;;  %v3126_v25 = vld [vmem:[#allocation14 + $0x14c] sm:$0xf0] }
  0xcf   : > { %1271 = vmatmul.bf16.vlgmr.msrb.gmra.mxu0 %v3965_v37  ;;  %1310 = vmatmul.bf16.vlgmr.msrb.gmra.mxu3 %v3965_v37 }
  0xd0   : > { %1349 = vmatmul.bf16.vlgmr.msra.gmra.mxu2 %v3965_v37  ;;  %v2591_v37 = vor.u32 %v3053_v47, %v2588_v48  ;;  %1842 = vmatpush.bf16.msrb.mxu1 %v2942_v24  ;;  %v3102_v47 = vld [vmem:[#allocation14 + $0x8c] sm:$0xf0]  ;;  %v3100_v48 = vld [vmem:[#allocation14 + $0x84] sm:$0xf]  ;;  %v2754_v24 = vor.u32 %v3092_v20, %v2751_v21  ;;  %v3109_v20 = vld [vmem:[#allocation14 + $0xcc] sm:$0xf] }
  0xd1   : > { %1319 = vmatpush.bf16.msra.mxu0 %v2635_v30  ;;  %1358 = vmatpush.bf16.msra.mxu3 %v2639_v31  ;;  %v3104_v30 = vld [vmem:[#allocation14 + $0xa4] sm:$0xf]  ;;  %v2798_v31 = vor.u32 %v3106_v29, %v2797_v28  ;;  %v2878_v28 = vor.u32 %v3126_v25, %v2877_v22  ;;  %v2823_v21 = vld [vmem:[#allocation14 + $0xd8] sm:$0xf0]  ;;  %v2949_v25 = vld [vmem:[#allocation14 + $0x1c8] sm:$0xf] }
  0xd2   : > { %v2802_v34 = vor.u32 %v3104_v30, %v2799_v32  ;;  %v3145_v30 = vld [vmem:[#allocation14 + $0x1ec] sm:$0xf] }
  0xd4   : > { %1856 = vmatpush.bf16.msrb.mxu2 %v2802_v34  ;;  %v2733_v34 = vld [vmem:[#allocation14 + $0x20] sm:$0xf] }
  0xd5   : > { %1320 = vmatpush.bf16.msra.mxu0 %v2619_v36  ;;  %1359 = vmatpush.bf16.msra.mxu3 %v2623_v38  ;;  %v2925_v36 = vld [vmem:[#allocation14 + $0x1a0] sm:$0xf]  ;;  %v3138_v38 = vld [vmem:[#allocation14 + $0x1ac] sm:$0xf0] }
  0xd6   : > { %v2926_v42 = vor.u32 %v3138_v38, %v2925_v36 }
  0xd8   : > { %1843 = vmatpush.bf16.msrb.mxu1 %v2926_v42 }
  0xd9   : > { %1321 = vmatpush.bf16.msra.mxu0 %v2603_v43  ;;  %1360 = vmatpush.bf16.msra.mxu3 %v2607_v44  ;;  %v2895_v43 = vld [vmem:[#allocation14 + $0x170] sm:$0xf0] }
  0xda   : > { %v2898_v45 = vor.u32 %v3128_v39, %v2895_v43  ;;  %v2735_v39 = vld [vmem:[#allocation14 + $0x30] sm:$0xf0] }
  0xdd   : > { %1322 = vmatpush.bf16.msra.mxu0 %v2587_v49  ;;  %1361 = vmatpush.bf16.msra.mxu3 %v2591_v37  ;;  %v2782_v37 = vor.u32 %v3102_v47, %v2781_v46  ;;  %v2951_v46 = vld [vmem:[#allocation14 + $0x1d8] sm:$0xf0] }
  0xe0   : > { %1323 = vmatmul.bf16.vlgmr.msra.gmra.mxu0 %v3968_v15  ;;  %1362 = vmatmul.bf16.vlgmr.msra.gmra.mxu3 %v3968_v15  ;;  %v2829_v15 = vld [vmem:[#allocation14 + $0xe0] sm:$0xf] }
  0xe1   : > { %1867 = vmatpush.bf16.msrb.mxu3 %v2962_v58  ;;  %v2830_v2 = vor.u32 %v3114_v63, %v2829_v15  ;;  %v2879_v58 = vld [vmem:[#allocation14 + $0x150] sm:$0xf0]  ;;  %v3096_v15 = vld [vmem:[#allocation14 + $0x64] sm:$0xf] }
  0xe3   : > { %1828 = vmatpush.bf16.msrb.mxu0 %v2830_v2  ;;  %v2770_v2 = vor.u32 %v3096_v15, %v2767_v0  ;;  %v725_v15 = vperm.slane %v3982_v59, 2  ;;  %v2845_v0 = vld [vmem:[#allocation14 + $0x100] sm:$0xf] }
  0xe5   : > { %1868 = vmatpush.bf16.msrb.mxu3 %v2946_v62  ;;  %v3098_v62 = vld [vmem:[#allocation14 + $0x6c] sm:$0xf0] }
  0xe6   : > { %v2766_v63 = vor.u32 %v3098_v62, %v2765_v61  ;;  %v3113_v61 = vld [vmem:[#allocation14 + $0xec] sm:$0xf]  ;;  %v2839_v62 = vld [vmem:[#allocation14 + $0xf8] sm:$0xf0] }
  0xe7   : > { %v1233_v50 = vpop.f32.mrf.mxu1  ;;  %1829 = vmatpush.bf16.msrb.mxu0 %v2814_v16  ;;  %v3094_v16 = vld [vmem:[#allocation14 + $0x4c] sm:$0xf0] }
  0xe9   : > { %1869 = vmatpush.bf16.msrb.mxu3 %v2930_v10  ;;  %v2863_v10 = vld [vmem:[#allocation14 + $0x130] sm:$0xf0] }
  0xea   : > { %v2866_v13 = vor.u32 %v3120_v5, %v2863_v10  ;;  %v3147_v5 = vld [vmem:[#allocation14 + $0x1f4] sm:$0xf0]  ;;  %v2821_v10 = vld [vmem:[#allocation14 + $0xc8] sm:$0xf] }
  0xeb   : > { %1830 = vmatpush.bf16.msrb.mxu0 %v2798_v31  ;;  %v2967_v31 = vld [vmem:[#allocation14 + $0x1f8] sm:$0xf0] }
  0xed   : > { %1870 = vmatpush.bf16.msrb.mxu3 %v2914_v27  ;;  %v2847_v27 = vld [vmem:[#allocation14 + $0x110] sm:$0xf0] }
  0xef   : > { %v1235_v51 = vpop.f32.mrf.mxu1  ;;  %1831 = vmatpush.bf16.msrb.mxu0 %v2782_v37  ;;  %v2717_v37 = vld [vmem:[#allocation14] sm:$0xf] }
  0xf0   : > { %v1246_v52 = vpop.f32.mrf.mxu2 }
  0xf1   : > { %1871 = vmatpush.bf16.msrb.mxu3 %v2898_v45  ;;  %v3141_v45 = vld [vmem:[#allocation14 + $0x1cc] sm:$0xf] }
  0xf3   : > { %1832 = vmatpush.bf16.msrb.mxu0 %v2766_v63  ;;  %v2842_v63 = vor.u32 %v3113_v61, %v2839_v62  ;;  %v2791_v61 = vld [vmem:[#allocation14 + $0x98] sm:$0xf0]  ;;  %v2917_v62 = vld [vmem:[#allocation14 + $0x188] sm:$0xf] }
  0xf8   : > { %v1248_v53 = vpop.f32.mrf.mxu2 }
  0xf9   : > { %v3134_v53 = vld [vmem:[#allocation14 + $0x18c] sm:$0xf0] }
 0x107   : > { %v3977_v54 = vpop.f32.mrf.mxu1 }
 0x10f   : > { %v1287_v55 = vpop.f32.mrf.mxu1 }
 0x110   : > { %v3124_v55 = vld [vmem:[#allocation14 + $0x144] sm:$0xf] }
 0x111   : > { %v2882_v60 = vor.u32 %v3124_v55, %v2879_v58  ;;  %v2719_v55 = vld [vmem:[#allocation14 + $0x10] sm:$0xf0] }
 0x113   : > { %1872 = vmatpush.bf16.msrb.mxu3 %v2882_v60 }
 0x117   : > { %1873 = vmatpush.bf16.msrb.mxu3 %v2866_v13  ;;  %v726_v13 = vperm.slane %v3982_v59, 3 }
 0x13c   : > { %v1220_v14 = vpop.f32.mrf.mxu0 }
 0x13d   : > { %v1221_v18 = vadd.f32 %v1220_v14, %v723_v1  ;;  %v3985_v19 = vpop.f32.mrf.mxu1  ;;  %v2749_v14 = vld [vmem:[#allocation14 + $0x40] sm:$0xf] }
 0x13f   : > { %v1234_v26 = vadd.f32 %v1233_v50, %v1221_v18  ;;  %v2783_v50 = vld [vmem:[#allocation14 + $0x90] sm:$0xf0]  ;;  %v2750_v18 = vor.u32 %v3094_v16, %v2749_v14 }
 0x140   : > { %v2786_v51 = vor.u32 %v3100_v48, %v2783_v50  ;;  %v3086_v50 = vld [vmem:[#allocation14 + $0xc] sm:$0xf0] }
 0x141   : > { %v1247_v33 = vadd.f32 %v1246_v52, %v1234_v26  ;;  %v2909_v52 = vld [vmem:[#allocation14 + $0x180] sm:$0xf]  ;;  %1833 = vmatpush.bf16.msrb.mxu0 %v2750_v18  ;;  %v3116_v26 = vld [vmem:[#allocation14 + $0x104] sm:$0xf] }
 0x142   : > { %v1259_v35 = vpop.f32.mrf.mxu3  ;;  %v2910_v57 = vor.u32 %v3134_v53, %v2909_v52  ;;  %1857 = vmatpush.bf16.msrb.mxu2 %v2786_v51  ;;  %v2850_v29 = vor.u32 %v3116_v26, %v2847_v27  ;;  %v3084_v51 = vld [vmem:[#allocation14 + $0x4] sm:$0xf]  ;;  %v2718_v53 = vor.u32 %v3086_v50, %v2717_v37  ;;  %v3143_v26 = vld [vmem:[#allocation14 + $0x1d4] sm:$0xf0]  ;;  %v3133_v27 = vld [vmem:[#allocation14 + $0x18c] sm:$0xf]  ;;  %v1338_v37 = vadd.f32 %v3985_v19, %v726_v13 }
 0x143   : > { %v2712_v40 = vmul.f32 -1.442695, %v1247_v33  ;;  %v3987_v41 = vpop.f32.mrf.mxu2  ;;  %v1260_v7 = vadd.f32 %v1259_v35, %v724_v56  ;;  %v2970_v33 = vor.u32 %v3145_v30, %v2967_v31  ;;  %v3090_v35 = vld [vmem:[#allocation14 + $0x2c] sm:$0xf0]  ;;  %v2837_v56 = vld [vmem:[#allocation14 + $0xe8] sm:$0xf]  ;;  %v2722_v58 = vor.u32 %v3084_v51, %v2719_v55 }
 0x144   : > { %v1222_v44 = vpop.f32.mrf.mxu0  ;;  %1844 = vmatpush.bf16.msrb.mxu1 %v2910_v57  ;;  %1874 = vmatpush.bf16.msrb.mxu3 %v2850_v29  ;;  %v2734_v38 = vor.u32 %v3090_v35, %v2733_v34  ;;  %v3115_v57 = vld [vmem:[#allocation14 + $0xf4] sm:$0xf0]  ;;  %v1299_v22 = vadd.f32 %v3987_v41, %v725_v15  ;;  %v2919_v30 = vld [vmem:[#allocation14 + $0x198] sm:$0xf0]  ;;  %v2805_v41 = vld [vmem:[#allocation14 + $0xa8] sm:$0xf] }
 0x145   : > { %3286 = vpow2.f32 %v2712_v40  ;;  %v1339_v49 = vpop.f32.mrf.mxu1  ;;  %v2861_v40 = vld [vmem:[#allocation14 + $0x120] sm:$0xf]  ;;  %v3122_v44 = vld [vmem:[#allocation14 + $0x12c] sm:$0xf0]  ;;  %v2838_v60 = vor.u32 %v3115_v57, %v2837_v56  ;;  %v3107_v34 = vld [vmem:[#allocation14 + $0xb4] sm:$0xf0] }
 0x146   : > { %1858 = vmatpush.bf16.msrb.mxu2 %v2770_v2  ;;  %1834 = vmatpush.bf16.msrb.mxu0 %v2734_v38  ;;  %v2862_v48 = vor.u32 %v3122_v44, %v2861_v40  ;;  %v2954_v49 = vor.u32 %v3141_v45, %v2951_v46  ;;  %v3105_v35 = vld [vmem:[#allocation14 + $0xac] sm:$0xf]  ;;  %v2807_v40 = vld [vmem:[#allocation14 + $0xb8] sm:$0xf0]  ;;  %v2806_v44 = vor.u32 %v3107_v34, %v2805_v41  ;;  %v2789_v55 = vld [vmem:[#allocation14 + $0x88] sm:$0xf] }
 0x147   : > { %v2810_v45 = vor.u32 %v3105_v35, %v2807_v40  ;;  %v3103_v56 = vld [vmem:[#allocation14 + $0x94] sm:$0xf0]  ;;  %v2757_v41 = vld [vmem:[#allocation14 + $0x48] sm:$0xf]  ;;  %v3093_v35 = vld [vmem:[#allocation14 + $0x4c] sm:$0xf] }
 0x148   : > { %1845 = vmatpush.bf16.msrb.mxu1 %v2894_v9  ;;  %1919 = vmatpush.bf16.msra.mxu3 %v2970_v33  ;;  %v2935_v9 = vld [vmem:[#allocation14 + $0x1b8] sm:$0xf0]  ;;  %v2922_v33 = vor.u32 %v3133_v27, %v2919_v30  ;;  %v3095_v34 = vld [vmem:[#allocation14 + $0x54] sm:$0xf0]  ;;  %v2885_v40 = vld [vmem:[#allocation14 + $0x148] sm:$0xf] }
 0x14a   : > { %v1261_v1 = vpop.f32.mrf.mxu3  ;;  %1859 = vmatpush.bf16.msrb.mxu2 %v2754_v24  ;;  %1835 = vmatpush.bf16.msrb.mxu0 %v2718_v53  ;;  %v2826_v24 = vor.u32 %v3109_v20, %v2823_v21  ;;  %v2903_v53 = vld [vmem:[#allocation14 + $0x178] sm:$0xf0]  ;;  %v3099_v20 = vld [vmem:[#allocation14 + $0x74] sm:$0xf0] }
 0x14b   : > { %v3287_v6 = vpop.eup %3286  ;;  %v1300_v8 = vpop.f32.mrf.mxu2  ;;  %v3118_v1 = vld [vmem:[#allocation14 + $0x10c] sm:$0xf0] }
 0x14c   : > { %v3990_v11 = vadd.f32 1.0, %v3287_v6  ;;  %v1272_v12 = vpop.f32.mrf.mxu0  ;;  %1846 = vmatpush.bf16.msrb.mxu1 %v2878_v28  ;;  %1920 = vmatpush.bf16.msra.mxu3 %v2954_v49  ;;  %v2846_v3 = vor.u32 %v3118_v1, %v2845_v0  ;;  %v3137_v6 = vld [vmem:[#allocation14 + $0x1ac] sm:$0xf]  ;;  %v2966_v8 = vor.u32 %v3147_v5, %v2965_v4  ;;  %v3135_v0 = vld [vmem:[#allocation14 + $0x194] sm:$0xf0] }
 0x14d   : > { %v1273_v17 = vadd.f32 %v1272_v12, %v1260_v7  ;;  %v3111_v12 = vld [vmem:[#allocation14 + $0xd4] sm:$0xf0]  ;;  %v3129_v49 = vld [vmem:[#allocation14 + $0x16c] sm:$0xf] }
 0x14e   : > { %3288 = vrcp.f32 %v3990_v11  ;;  %1880 = vmatpush.bf16.msra.mxu0 %v2838_v60  ;;  %v2822_v18 = vor.u32 %v3111_v12, %v2821_v10  ;;  %v1381_v28 = vand.u32 2147483647, %v3990_v11  ;;  %v1383_v29 = vand.u32 2147483648, %v3990_v11  ;;  %v3101_v60 = vld [vmem:[#allocation14 + $0x8c] sm:$0xf] }
 0x14f   : > { %v1286_v23 = vadd.f32 %v3977_v54, %v1273_v17  ;;  %v3088_v54 = vld [vmem:[#allocation14 + $0x24] sm:$0xf]  ;;  %v2938_v17 = vor.u32 %v3137_v6, %v2935_v9  ;;  %v2906_v57 = vor.u32 %v3129_v49, %v2903_v53  ;;  %vm1377_vm2 = vweird.f32 %v3990_v11  ;;  %v3125_v1 = vld [vmem:[#allocation14 + $0x14c] sm:$0xf]  ;;  %v2855_v49 = vld [vmem:[#allocation14 + $0x118] sm:$0xf0] }
 0x150   : > { %v2738_v43 = vor.u32 %v3088_v54, %v2735_v39  ;;  %1847 = vmatpush.bf16.msrb.mxu1 %v2862_v48  ;;  %v3139_v48 = vld [vmem:[#allocation14 + $0x1b4] sm:$0xf0]  ;;  %vm4026_vm4 = vcmp.eq.f32.partialorder %v1381_v28, 8.507059e+37  ;;  %v1384_v5 = vor.u32 1.1754944e-38, %v1383_v29  ;;  %v2918_v6 = vor.u32 %v3135_v0, %v2917_v62  ;;  %v3121_v28 = vld [vmem:[#allocation14 + $0x12c] sm:$0xf] }
 0x151   : > { %v2713_v32 = vmul.f32 -1.442695, %v1286_v23  ;;  %1921 = vmatpush.bf16.msra.mxu3 %v2938_v17  ;;  %v2871_v29 = vld [vmem:[#allocation14 + $0x138] sm:$0xf0]  ;;  %v3091_v53 = vld [vmem:[#allocation14 + $0x34] sm:$0xf0] }
 0x152   : > { %v3994_v36 = vpop.f32.mrf.mxu3  ;;  %1860 = vmatpush.bf16.msrb.mxu2 %v2738_v43  ;;  %1881 = vmatpush.bf16.msra.mxu0 %v2822_v18  ;;  %v1432_v43 = vld [vmem:[#allocation4] sm:$0xff]  ;;  %v3085_v4 = vld [vmem:[#allocation14 + $0xc] sm:$0xf] }
 0x153   : > { %3290 = vpow2.f32 %v2713_v32  ;;  %v3996_v42 = vpop.f32.mrf.mxu2  ;;  %v2950_v32 = vor.u32 %v3143_v26, %v2949_v25  ;;  %v1312_v54 = vadd.f32 %v3994_v36, %v1299_v22  ;;  %v4013_v46 = vpack.c.bf16 %v1432_v43, %v1432_v43  ;;  %v2901_v25 = vld [vmem:[#allocation14 + $0x168] sm:$0xf]  ;;  %v1367_v26 = vld [vmem:[#allocation3] sm:$0xff]  ;;  %v3127_v43 = vld [vmem:[#allocation14 + $0x154] sm:$0xf0] }
 0x154   : > { %v1274_v47 = vpop.f32.mrf.mxu0  ;;  %v3998_v52 = vpop.eup %3288  ;;  %1848 = vmatpush.bf16.msrb.mxu1 %v2846_v3  ;;  %v1351_v19 = vadd.f32 %v3996_v42, %v1338_v37  ;;  %v2741_v37 = vld [vmem:[#allocation14 + $0x28] sm:$0xf]  ;;  %v3123_v62 = vld [vmem:[#allocation14 + $0x134] sm:$0xf0] }
 0x155   : > { %v1373_v2 = vmul.f32 %v3998_v52, %v3990_v11  ;;  %v2933_v47 = vld [vmem:[#allocation14 + $0x1a8] sm:$0xf]  ;;  %1922 = vmatpush.bf16.msra.mxu3 %v2922_v33  ;;  %vm1378_vm3 = vweird.f32 %v3998_v52  ;;  %v2874_v33 = vor.u32 %v3121_v28, %v2871_v29  ;;  %v3087_v0 = vld [vmem:[#allocation14 + $0x14] sm:$0xf0]  ;;  %v1498_v29 = vld [vmem:[#allocation15] sm:$0xf] }
 0x156   : > { %1861 = vmatpush.bf16.msrb.mxu2 %v2722_v58  ;;  %v2934_v36 = vor.u32 %v3139_v48, %v2933_v47  ;;  %1882 = vmatpush.bf16.msra.mxu0 %v2806_v44  ;;  %v2790_v58 = vor.u32 %v3103_v56, %v2789_v55  ;;  %vm4037_vm7 = vmor %vm1377_vm2, %vm1378_vm3  ;;  %v2773_v11 = vld [vmem:[#allocation14 + $0x68] sm:$0xf]  ;;  %v2886_v47 = vor.u32 %v3127_v43, %v2885_v40  ;;  %v3117_v48 = vld [vmem:[#allocation14 + $0x10c] sm:$0xf] }
 0x157   : > { %v1374_v59 = vsub.f32 1.0, %v1373_v2  ;;  %1875 = vmatmul.bf16.vlgmr.msrb.gmra.mxu3 %v4013_v46  ;;  %v2887_v2 = vld [vmem:[#allocation14 + $0x158] sm:$0xf0]  ;;  %1849 = vmatmul.bf16.vlgmr.msrb.gmra.mxu1 %v4013_v46  ;;  %v2774_v22 = vor.u32 %v3099_v20, %v2773_v11  ;;  %v3089_v55 = vld [vmem:[#allocation14 + $0x2c] sm:$0xf] }
 0x158   : > { %1893 = vmatpush.bf16.msra.mxu1 %v2966_v8  ;;  %v2890_v9 = vor.u32 %v3125_v1, %v2887_v2  ;;  %v2743_v56 = vld [vmem:[#allocation14 + $0x38] sm:$0xf0] }
 0x159   : > { %v3291_v7 = vpop.eup %3290  ;;  %v1375_v51 = vmul.f32 %v3998_v52, %v1374_v59  ;;  %1923 = vmatpush.bf16.msra.mxu3 %v2906_v57  ;;  %v3131_v59 = vld [vmem:[#allocation14 + $0x174] sm:$0xf0] }
 0x15a   : > { %v4004_v14 = vadd.f32 1.0, %v3291_v7  ;;  %v1313_v16 = vpop.f32.mrf.mxu3  ;;  %1906 = vmatpush.bf16.msra.mxu2 %v2842_v63  ;;  %v2794_v63 = vor.u32 %v3101_v60, %v2791_v61  ;;  %1883 = vmatpush.bf16.msra.mxu0 %v2790_v58  ;;  %v2742_v60 = vor.u32 %v3091_v53, %v2741_v37  ;;  %v2869_v61 = vld [vmem:[#allocation14 + $0x128] sm:$0xf]  ;;  %v1503_v37 = vperm.slane %v1498_v29, 3 }
 0x15b   : > { %v1352_v23 = vpop.f32.mrf.mxu2  ;;  %v1376_v7 = vadd.f32 %v3998_v52, %v1375_v51 }
 0x15c   : > { %3292 = vrcp.f32 %v4004_v14  ;;  %v1402_v38 = vand.u32 2147483648, %v4004_v14  ;;  %v1400_v39 = vand.u32 2147483647, %v4004_v14  ;;  %1894 = vmatpush.bf16.msra.mxu1 %v2950_v32  ;;  %vm1396_vm6 = vweird.f32 %v4004_v14  ;;  %v3097_v23 = vld [vmem:[#allocation14 + $0x6c] sm:$0xf] }
 0x15d   : > { %v1324_v31 = vpop.f32.mrf.mxu0  ;;  %1924 = vmatpush.bf16.msra.mxu3 %v2890_v9  ;;  %v1380_v30 = vsel %vm4037_vm7, %v3998_v52, %v1376_v7  ;;  %v2902_v32 = vor.u32 %v3131_v59, %v2901_v25 }
 0x15e   : > { %1907 = vmatpush.bf16.msra.mxu2 %v2826_v24  ;;  %v1325_v50 = vadd.f32 %v1324_v31, %v1312_v54  ;;  %vm4041_vm8 = vcmp.eq.f32.partialorder %v1400_v39, 8.507059e+37  ;;  %v1403_v16 = vor.u32 1.1754944e-38, %v1402_v38  ;;  %v2775_v24 = vld [vmem:[#allocation14 + $0x78] sm:$0xf0]  ;;  %1884 = vmatpush.bf16.msra.mxu0 %v2774_v22  ;;  %v2758_v54 = vor.u32 %v3095_v34, %v2757_v41 }
 0x15f   : > { %v2778_v27 = vor.u32 %v3097_v23, %v2775_v24  ;;  %v2759_v39 = vld [vmem:[#allocation14 + $0x58] sm:$0xf0] }
 0x160   : > { %1895 = vmatpush.bf16.msra.mxu1 %v2934_v36  ;;  %3294 = vtanh.f32 %v1325_v50  ;;  %v2762_v52 = vor.u32 %v3093_v35, %v2759_v39  ;;  %v1385_v50 = vsel %vm4026_vm4, %v1384_v5, %v1380_v30  ;;  %v2858_v36 = vor.u32 %v3117_v48, %v2855_v49  ;;  %v2727_v5 = vld [vmem:[#allocation14 + $0x18] sm:$0xf0] }
 0x161   : > { %1925 = vmatpush.bf16.msra.mxu3 %v2874_v33  ;;  %v1501_v35 = vperm.slane %v1498_v29, 1 }
 0x162   : > { %v4018_v15 = vpop.eup %3292  ;;  %1908 = vmatpush.bf16.msra.mxu2 %v2810_v45  ;;  %1885 = vmatpush.bf16.msra.mxu0 %v2758_v54 }
 0x163   : > { %v1392_v3 = vmul.f32 %v4018_v15, %v4004_v14  ;;  %vm1397_vm5 = vweird.f32 %v4018_v15  ;;  %v1363_v42 = vpop.f32.mrf.mxu3 }
 0x164   : > { %v1364_v8 = vadd.f32 %v1363_v42, %v1351_v19  ;;  %vm4047_vm9 = vmor %vm1396_vm6, %vm1397_vm5  ;;  %1896 = vmatpush.bf16.msra.mxu1 %v2918_v6  ;;  %v2746_v19 = vor.u32 %v3089_v55, %v2743_v56  ;;  %v2853_v42 = vld [vmem:[#allocation14 + $0x108] sm:$0xf]  ;;  %v3119_v6 = vld [vmem:[#allocation14 + $0x114] sm:$0xf0] }
 0x165   : > { %v1393_v10 = vsub.f32 1.0, %v1392_v3  ;;  %v1326_v17 = vpop.f32.mrf.mxu0  ;;  %v2870_v3 = vor.u32 %v3123_v62, %v2869_v61  ;;  %1926 = vmatpush.bf16.msra.mxu3 %v2858_v36  ;;  %v2854_v9 = vor.u32 %v3119_v6, %v2853_v42 }
 0x166   : > { %v2714_v14 = vmul.f32 -1.442695, %v1364_v8  ;;  %1909 = vmatpush.bf16.msra.mxu2 %v2794_v63  ;;  %v3295_v38 = vpop.eup %3294  ;;  %v2725_v63 = vld [vmem:[#allocation14 + $0x8] sm:$0xf]  ;;  %1886 = vmatpush.bf16.msra.mxu0 %v2742_v60  ;;  %v2730_v8 = vor.u32 %v3085_v4, %v2727_v5 }
 0x167   : > { %v1394_v21 = vmul.f32 %v4018_v15, %v1393_v10  ;;  %v1427_v58 = vmul.f32 %v3295_v38, %v1385_v50  ;;  %v2726_v7 = vor.u32 %v3087_v0, %v2725_v63 }
 0x168   : > { %3296 = vpow2.f32 %v2714_v14  ;;  %1897 = vmatpush.bf16.msra.mxu1 %v2902_v32  ;;  %1927 = vmatmul.bf16.vlgmr.msra.gmra.mxu3 %v4013_v46  ;;  %v1500_v32 = vperm.slane %v1498_v29, 0 }
 0x169   : > { %v1395_v31 = vadd.f32 %v4018_v15, %v1394_v21 }
 0x16a   : > { %1910 = vmatpush.bf16.msra.mxu2 %v2778_v27  ;;  %1887 = vmatpush.bf16.msra.mxu0 %v2726_v7 }
 0x16b   : > { %v1399_v44 = vsel %vm4047_vm9, %v4018_v15, %v1395_v31  ;;  %v1365_v45 = vpop.f32.mrf.mxu3 }
 0x16c   : > { %v1404_v51 = vsel %vm4041_vm8, %v1403_v16, %v1399_v44  ;;  %1898 = vmatpush.bf16.msra.mxu1 %v2886_v47 }
 0x16d   : > { %v1426_v57 = vmul.f32 %v1404_v51, %v1367_v26  ;;  %v1502_v51 = vperm.slane %v1498_v29, 2 }
 0x16e   : > { %v3297_v15 = vpop.eup %3296  ;;  %1911 = vmatpush.bf16.msra.mxu2 %v2762_v52 }
 0x16f   : > { %v1428_v1 = vadd.f32 %v1427_v58, %v1426_v57  ;;  %v1410_v2 = vadd.f32 1.0, %v3297_v15 }
 0x170   : > { %1899 = vmatpush.bf16.msra.mxu1 %v2870_v3 }
 0x171   : > { %1997 = vst [vmem:[#allocation3] sm:$0xff] %v1428_v1  ;;  %3298 = vrcp.f32 %v1410_v2  ;;  %v1422_v16 = vand.u32 2147483648, %v1410_v2  ;;  %v1420_v18 = vand.u32 2147483647, %v1410_v2  ;;  %vm1416_vm11 = vweird.f32 %v1410_v2 }
 0x172   : > { %2003 = vst [vmem:[#allocation21] sm:$0xff] %v1428_v1  ;;  %1912 = vmatpush.bf16.msra.mxu2 %v2746_v19  ;;  %3300 = vtanh.f32 %v1428_v1 }
 0x173   : > { %v1423_v11 = vor.u32 1.1754944e-38, %v1422_v16  ;;  %vm1421_vm13 = vcmp.eq.f32.partialorder %v1420_v18, 8.507059e+37  ;;  %3177 = dma.vmem_to_hbm [thread:$0]  (%p276_p2), %s2063_s16, 128, %s2065_s30, [#allocation22]  }
 0x174   : > { %1900 = vmatpush.bf16.msra.mxu1 %v2854_v9  ;;  %s3746_s16 = smov [#allocation24]  }
 0x175   : > { %s4086_s24 = sshll.u32 %s3746_s16, 4  ;;  %s3546_s16 = scalar_lea.hbm %s4183_s11, 48  ;;  %s2087_s24 = int_to_ptr.vmem [resolvable:$true] %s4086_s24 }
 0x176   : > { %1913 = vmatpush.bf16.msra.mxu2 %v2730_v8  ;;  %p3548_p8 = scmp.lt.s32.totalorder %s3546_s16, %s3542_s2 }
 0x177   : > { %v3299_v10 = vpop.eup %3298  ;;  %1901 = vmatmul.bf16.vlgmr.msra.gmra.mxu1 %v4013_v46 }
 0x178   : > { %v1412_v12 = vmul.f32 %v3299_v10, %v1410_v2  ;;  %vm1417_vm10 = vweird.f32 %v3299_v10  ;;  %v3301_v21 = vpop.eup %3300  ;;  %p3549_p9 = por %p3548_p8, %p3547_p7 }
 0x179   : > { %vm1418_vm12 = vmor %vm1416_vm11, %vm1417_vm10 }
 0x17a   : > { %v1413_v13 = vsub.f32 1.0, %v1412_v12  ;;  %p3550_p10 = pnand %p3549_p9, %p3545_p4 }
 0x17c   : > { %v1414_v17 = vmul.f32 %v3299_v10, %v1413_v13  ;;  %v1932_v13 = vld [vmem:[#allocation5] sm:$0xff] }
 0x17e   : > { %v1415_v14 = vadd.f32 %v3299_v10, %v1414_v17 }
 0x180   : > { %v1419_v20 = vsel %vm1418_vm12, %v3299_v10, %v1415_v14 }
 0x181   : > { %v1424_v22 = vsel %vm1421_vm13, %v1423_v11, %v1419_v20 }
 0x182   : > { %v1430_v23 = vmul.f32 %v3301_v21, %v1424_v22 }
 0x184   : > { %v1431_v24 = vpack.c.bf16 %v1430_v23, %v1430_v23  ;;  %1996 = vst [vmem:[#allocation2] sm:$0xff] %v1430_v23 }
 0x185   : > { %2002 = vst [vmem:[#allocation20] sm:$0xff] %v1430_v23 }
 0x186   : > { %1836 = vmatmul.bf16.vlgmr.msrb.gmra.mxu0 %v1431_v24  ;;  %1862 = vmatmul.bf16.vlgmr.msrb.gmra.mxu2 %v1431_v24 }
 0x196   : > { %1888 = vmatmul.bf16.vlgmr.msra.gmra.mxu0 %v1431_v24  ;;  %1914 = vmatmul.bf16.vlgmr.msra.gmra.mxu2 %v1431_v24 }
 0x1d4   : > { %v1850_v25 = vpop.f32.mrf.mxu1 }
 0x1da   : > { %v1876_v46 = vpop.f32.mrf.mxu3 }
 0x1dc   : > { %v1852_v27 = vpop.f32.mrf.mxu1 }
 0x1e2   : > { %v1878_v26 = vpop.f32.mrf.mxu3 }
 0x1eb   : > { %v1928_v59 = vpop.f32.mrf.mxu3 }
 0x1f3   : > { %v1930_v30 = vpop.f32.mrf.mxu3 }
 0x1f4   : > { %v1902_v28 = vpop.f32.mrf.mxu1 }
 0x1fc   : > { %v1904_v31 = vpop.f32.mrf.mxu1 }
 0x203   : > { %v1837_v33 = vpop.f32.mrf.mxu0 }
 0x204   : > { %v1838_v41 = vadd.f32 %v1837_v33, %v1500_v32 }
 0x206   : > { %v1851_v34 = vadd.f32 %v1850_v25, %v1838_v41 }
 0x208   : > { %v2971_v38 = vmul.f32 -1.442695, %v1851_v34 }
 0x209   : > { %v1863_v54 = vpop.f32.mrf.mxu2 }
 0x20a   : > { %3302 = vpow2.f32 %v2971_v38  ;;  %v1864_v39 = vadd.f32 %v1863_v54, %v1501_v35 }
 0x20b   : > { %v1839_v40 = vpop.f32.mrf.mxu0 }
 0x20c   : > { %v1877_v43 = vadd.f32 %v1876_v46, %v1864_v39 }
 0x20e   : > { %v2972_v44 = vmul.f32 -1.442695, %v1877_v43 }
 0x210   : > { %v3303_v45 = vpop.eup %3302  ;;  %3304 = vpow2.f32 %v2972_v44 }
 0x211   : > { %v1936_v52 = vadd.f32 1.0, %v3303_v45  ;;  %v1865_v47 = vpop.f32.mrf.mxu2 }
 0x213   : > { %3306 = vrcp.f32 %v1936_v52  ;;  %v1889_v48 = vpop.f32.mrf.mxu0  ;;  %v1948_v2 = vand.u32 2147483648, %v1936_v52  ;;  %vm1942_vm15 = vweird.f32 %v1936_v52  ;;  %v1946_v5 = vand.u32 2147483647, %v1936_v52 }
 0x214   : > { %v1890_v57 = vadd.f32 %v1889_v48, %v1502_v51 }
 0x215   : > { %v1949_v9 = vor.u32 1.1754944e-38, %v1948_v2  ;;  %vm1947_vm3 = vcmp.eq.f32.partialorder %v1946_v5, 8.507059e+37 }
 0x216   : > { %v3305_v49 = vpop.eup %3304  ;;  %v1903_v63 = vadd.f32 %v1902_v28, %v1890_v57 }
 0x217   : > { %v1955_v50 = vadd.f32 1.0, %v3305_v49 }
 0x219   : > { %v3307_v36 = vpop.eup %3306  ;;  %3308 = vrcp.f32 %v1955_v50  ;;  %v1915_v53 = vpop.f32.mrf.mxu2  ;;  %v1967_v42 = vand.u32 2147483648, %v1955_v50  ;;  %v1965_v8 = vand.u32 2147483647, %v1955_v50  ;;  %vm1961_vm2 = vweird.f32 %v1955_v50 }
 0x21a   : > { %v1938_v55 = vmul.f32 %v3307_v36, %v1936_v52  ;;  %v1916_v56 = vadd.f32 %v1915_v53, %v1503_v37  ;;  %vm1943_vm14 = vweird.f32 %v3307_v36 }
 0x21b   : > { %v1891_v58 = vpop.f32.mrf.mxu0  ;;  %vm1944_vm0 = vmor %vm1942_vm15, %vm1943_vm14  ;;  %v1968_v17 = vor.u32 1.1754944e-38, %v1967_v42  ;;  %vm1966_vm5 = vcmp.eq.f32.partialorder %v1965_v8, 8.507059e+37 }
 0x21c   : > { %v1939_v60 = vsub.f32 1.0, %v1938_v55  ;;  %v1929_v61 = vadd.f32 %v1928_v59, %v1916_v56 }
 0x21e   : > { %v1940_v62 = vmul.f32 %v3307_v36, %v1939_v60  ;;  %v2973_v15 = vmul.f32 -1.442695, %v1929_v61 }
 0x21f   : > { %v3309_v19 = vpop.eup %3308 }
 0x220   : > { %v1957_v0 = vmul.f32 %v3309_v19, %v1955_v50  ;;  %v1941_v1 = vadd.f32 %v3307_v36, %v1940_v62  ;;  %3310 = vpow2.f32 %v2973_v15  ;;  %vm1962_vm1 = vweird.f32 %v3309_v19 }
 0x221   : > { %v1917_v3 = vpop.f32.mrf.mxu2  ;;  %3312 = vtanh.f32 %v1903_v63  ;;  %vm1963_vm4 = vmor %vm1961_vm2, %vm1962_vm1 }
 0x222   : > { %v1958_v4 = vsub.f32 1.0, %v1957_v0  ;;  %v1945_v7 = vsel %vm1944_vm0, %v3307_v36, %v1941_v1 }
 0x223   : > { %v1950_v16 = vsel %vm1947_vm3, %v1949_v9, %v1945_v7 }
 0x224   : > { %v1959_v6 = vmul.f32 %v3309_v19, %v1958_v4 }
 0x226   : > { %v3311_v10 = vpop.eup %3310  ;;  %v1960_v12 = vadd.f32 %v3309_v19, %v1959_v6 }
 0x227   : > { %v1975_v18 = vadd.f32 1.0, %v3311_v10  ;;  %v3313_v11 = vpop.eup %3312 }
 0x228   : > { %v1964_v14 = vsel %vm1963_vm4, %v3309_v19, %v1960_v12  ;;  %v1992_v22 = vmul.f32 %v3313_v11, %v1950_v16 }
 0x229   : > { %v1969_v20 = vsel %vm1966_vm5, %v1968_v17, %v1964_v14  ;;  %3314 = vrcp.f32 %v1975_v18 }
 0x22a   : > { %v1991_v21 = vmul.f32 %v1969_v20, %v1932_v13 }
 0x22c   : > { %v1993_v23 = vadd.f32 %v1992_v22, %v1991_v21 }
 0x22e   : > { %1999 = vst [vmem:[#allocation5] sm:$0xff] %v1993_v23 }
 0x22f   : > { %v3315_v24 = vpop.eup %3314  ;;  %2001 = vst [vmem:[%s583_s18] sm:$0xff] %v1993_v23 }
 0x230   : > { %2005 = vst [vmem:[#allocation24] sm:$0xff] %v1993_v23  ;;  %v1977_v46 = vmul.f32 %v3315_v24, %v1975_v18 }
 0x231   : > { %3553 = shalt.err (!%p3550_p10)
}
 0x232   : > { %3173 = dma.vmem_to_hbm [thread:$0]  (%p3870_p5), %s2039_s10, 128, %s2041_s14, %s2012_s27   ;;  %v1978_v25 = vsub.f32 1.0, %v1977_v46  ;;  %v1987_v26 = vand.u32 2147483648, %v1975_v18  ;;  %3316 = vtanh.f32 %v1993_v23  ;;  %vm1982_vm6 = vweird.f32 %v3315_v24 }
 0x233   : > { %3175 = dma.vmem_to_hbm [thread:$0]  (%p276_p2), %s2051_s21, 128, %s2053_s26, [#allocation19]   ;;  %v1985_v59 = vand.u32 2147483647, %v1975_v18  ;;  %vm1981_vm7 = vweird.f32 %v1975_v18 }
 0x234   : > { %3181 = dma.vmem_to_hbm [thread:$0]  (%p276_p2), %s2087_s24, 128, %s2089_s20, [#allocation25]   ;;  %v1979_v27 = vmul.f32 %v3315_v24, %v1978_v25  ;;  %vm1983_vm8 = vmor %vm1981_vm7, %vm1982_vm6  ;;  %v1988_v29 = vor.u32 1.1754944e-38, %v1987_v26 }
 0x235   : > { %s4225_s18 = sshll.u32 %s3849_s22, 3  ;;  %s4226_s6 = sld [smem:[#allocation44_spill]]  ;;  %vm1986_vm9 = vcmp.eq.f32.partialorder %v1985_v59, 8.507059e+37 }
 0x236   : > { %v1980_v28 = vadd.f32 %v3315_v24, %v1979_v27  ;;  %s4227_s10 = scalar_lea.vmem [#allocation17], %s3946_s4  ;;  %s3747_s21 = smov [#allocation23]  }
 0x237   : > { %s4119_s20 = sshll.u32 %s4227_s10, 4  ;;  %s2074_s26 = sshll.u32 %s3747_s21, 4  ;;  %s2025_s20 = int_to_ptr.vmem [resolvable:$true] %s4119_s20  ;;  %s2075_s26 = int_to_ptr.vmem [resolvable:$true] %s2074_s26 }
 0x238   : > { %v1984_v30 = vsel %vm1983_vm8, %v3315_v24, %v1980_v28  ;;  %v3317_v31 = vpop.eup %3316  ;;  %s4228_s29 = sld [smem:[#allocation45_spill]]  ;;  %s4229_s16 = smov %s4227_s10 }
 0x239   : > { %v1989_v32 = vsel %vm1986_vm9, %v1988_v29, %v1984_v30  ;;  %s4230_s17 = sand.u32 1, %s3724_s19  }
 0x23a   : > { %v1995_v33 = vmul.f32 %v3317_v31, %v1989_v32 }
 0x23b   : > { %s2022_s2 = scalar_lea.hbm %s4226_s6, %s4225_s18  ;;  %s2007_s18 = scalar_lea.sflag [#allocation8], %s4230_s17 }
 0x23c   : > { %s2026_s14 = sshll.u32 %s2022_s2, 4  ;;  %1998 = vst [vmem:[#allocation4] sm:$0xff] %v1995_v33  ;;  %s3630_s21 = scalar_lea.hbm %s4226_s6, 48  ;;  %s2027_s14 = int_to_ptr.hbm [resolvable:$true] %s2026_s14 }
 0x23d   : > { %2000 = vst [vmem:[%s4229_s16] sm:$0xff] %v1995_v33  ;;  %s3624_s23 = sshra.s32 %s2027_s14, 4  ;;  %s3625_s23 = int_to_ptr.hbm [resolvable:$true] %s3624_s23 }
 0x23e   : > { %s2076_s30 = sshll.u32 %s4228_s29, 4  ;;  %s3626_s25 = scalar_lea.hbm %s3625_s23, 8  ;;  %s2077_s30 = int_to_ptr.hbm [resolvable:$true] %s2076_s30 }
 0x23f   : > { %p3627_p11 = scmp.ne.s32.totalorder %s3625_s23, %s3626_s25  ;;  %p3631_p0 = scmp.lt.s32.totalorder %s3625_s23, %s4226_s6 }
 0x240   : > { %p3632_p1 = scmp.lt.s32.totalorder %s3630_s21, %s3626_s25 }
 0x241   : > { %p3628_p12 = pnand %p3627_p11, %p3870_p5 }
 0x242   : > { %p3633_p3 = por %p3632_p1, %p3631_p0 }
 0x243   : > { %p3629_p13 = pneg %p3628_p12 }
 0x245   : > { %p3634_p4 = pnand %p3633_p3, %p3629_p13 }
 0x247   : > { %3637 = shalt.err (!%p3634_p4)
}
 0x248   : > { %3172 = dma.vmem_to_hbm [thread:$0]  (%p3870_p5), %s2025_s20, 128, %s2027_s14, %s2007_s18   ;;  %2004 = vst [vmem:[#allocation23] sm:$0xff] %v1995_v33 }
 0x249   : > { %3179 = dma.vmem_to_hbm [thread:$0]  (%p276_p2), %s2075_s26, 128, %s2077_s30, [#allocation22]  }
 0x24a   : > { %3699 = dma.done.wait (%p276_p2), [#allocation19], 128  }
 0x24b   : > { %3701 = vsyncadd (%p276_p2), [#allocation19], 4294967168 }
 0x24c   : > { %3703 = dma.done.wait (%p276_p2), [#allocation22], 256  }
 0x24d   : > { %3705 = vsyncadd (%p276_p2), [#allocation22], 4294967040 }
 0x24e   : > { %3707 = dma.done.wait (%p276_p2), [#allocation25], 128  }
 0x24f   : > { %3709 = vsyncadd (%p276_p2), [#allocation25], 4294967168 }
 0x250 PF: > { %s4231_s28 = sld [smem:[#allocation37_spill]] }
 0x251   : > { %s4232_s4 = sld [smem:[#allocation35_spill]] }
 0x256   : > { %p3238_p5 = scmp.ge.s32.totalorder %s4231_s28, 2 }
 0x257   : > { %s2120_s14 = sand.u32 1, %s4232_s4  }
 0x258   : > { %p3212_p7 = pnand %p3238_p5, %p3874_p6  ;;  %s2121_s26 = scalar_lea.sflag [#allocation8], %s2120_s14 }
 0x25a   : > { %p3213_p8 = pneg %p3212_p7 }
 0x25c   : > { %3711 = dma.done.wait (%p3213_p8), %s2121_s26, 128  }
 0x25d   : > { %3713 = vsyncadd (%p3213_p8), %s2121_s26, 4294967168  ;;  %s4234_s29 = sadd.s32 4294967294, %s4231_s28  }
 0x25e   : > { %s2130_s30 = sand.u32 1, %s4234_s29  }
 0x25f   : > { %s2131_s16 = scalar_lea.sflag [#allocation19], %s2130_s30 }
 0x260   : > { %3715 = dma.done.wait (%p3213_p8), %s2131_s16, 128  }
 0x261   : > { %3717 = vsyncadd (%p3213_p8), %s2131_s16, 4294967168  ;;  %s4235_s21 = sld [smem:[#allocation38_spill]]  ;;  %s4238_s18 = smov %s3724_s19 }
 0x262   : > { %s4236_s22 = sld [smem:[#allocation36_spill]] }
 0x263   : > { %s4237_s20 = sld [smem:[#allocation39_spill]] }
 0x267   : > { %p35_p2 = scmp.ge.s32.totalorder %s4235_s21, 8  }
 0x268   : > { %s4239_s19 = smov %s4236_s22 }
 0x269   :  { %37 = sbr.rel (!%p35_p2) target bundleno = 17 (0x11), region = 176 }
 0x26e   :  { %2137 = vsyncpa [#allocation7], 1 }
 0x26f   :  { %2139 = vsyncpa [#allocation7 + $0x1], 1 }
 0x270   :  { %2140 = vsyncpa [#allocation10], 1 }
 0x271   :  { %2141 = vsyncpa [#allocation13], 1 }
 0x272   :  { %2142 = vsyncpa [#allocation16], 1 }
 0x273   :  { %2143 = vsyncpa [#allocation8], 1 }
 0x274   :  { %2145 = vsyncpa [#allocation8 + $0x1], 1 }
 0x275   :  { %2146 = vsyncpa [#allocation19], 1 }
 0x276   :  { %2148 = vsyncpa [#allocation19 + $0x1], 1 }
 0x277   :  { %2149 = vsyncpa [#allocation22], 1 }
 0x278   :  { %2150 = vsyncpa [#allocation25], 1 }

</bundles_post_ra>
